<compile_context>
chip_gen: v6e
topology: v6e:2x2x1
jax: 0.10.0
libtpu: 0.0.40
codegen_flags: <defaults>
</compile_context>

<pallas_src>
import math
import numpy as np

import jax
import jax.numpy as jnp
from jax import lax
from jax.experimental import pallas as pl
from jax.experimental.pallas import tpu as pltpu


def _round_up(x, m):
    return (x + m - 1) // m * m


# ---------------------------------------------------------------------------
# Filterbank construction (numpy; parameter setup, not the hot path).
# ---------------------------------------------------------------------------
def frequency_set(f_min, n_bins, bins_per_octave):
    n_octaves = math.ceil(n_bins / bins_per_octave)
    ratios = 2.0 ** (np.arange(0, bins_per_octave * n_octaves, dtype=np.float64)
                     / bins_per_octave)
    return f_min * ratios[:n_bins], n_octaves


def relative_bandwidths(freqs, n_bins, bins_per_octave):
    if n_bins > 1:
        log_freqs = np.log2(freqs)
        bpo = np.empty_like(freqs)
        bpo[0] = 1.0 / (log_freqs[1] - log_freqs[0])
        bpo[-1] = 1.0 / (log_freqs[-1] - log_freqs[-2])
        bpo[1:-1] = 2.0 / (log_freqs[2:] - log_freqs[:-2])
        alpha = (2.0 ** (2.0 / bpo) - 1.0) / (2.0 ** (2.0 / bpo) + 1.0)
    else:
        r = 2.0 ** (1.0 / bins_per_octave)
        alpha = np.array([(r ** 2 - 1.0) / (r ** 2 + 1.0)], dtype=np.float64)
    return alpha


def wavelet_lengths(freqs, sr, alpha, gamma):
    Q = 1.0 / alpha
    cutoff_freq = np.max(freqs * (1.0 + 0.5 * 3.0 / Q) + 0.5 * gamma)
    lengths = Q * sr / (freqs + gamma / alpha)
    return lengths, float(cutoff_freq)


def _hann_window(n):  # torch.hann_window default: periodic
    if n <= 1:
        return np.ones(n, dtype=np.float64)
    return 0.5 * (1.0 - np.cos(2.0 * np.pi * np.arange(n, dtype=np.float64) / n))


def wavelet_fbank(freqs, sr, alpha, gamma):
    lengths, _ = wavelet_lengths(freqs, sr, alpha, gamma)
    pad_to_size = 1 << (int(np.max(lengths)) - 1).bit_length()
    filters = []
    for ilen, freq in zip(lengths, freqs):
        start = math.floor(-ilen / 2.0)          # (-ilen) // 2 in torch float semantics
        end = math.floor(ilen / 2.0)             # ilen // 2
        t = np.arange(start, end, dtype=np.float64) * 2.0 * np.pi * freq / sr
        sig = np.cos(t) + 1j * np.sin(t)
        sig_len = len(sig)
        sig = sig * _hann_window(sig_len)
        sig = sig / max(np.sum(np.abs(sig)), 1e-12)   # F.normalize(p=1, dim=0)
        l_pad = math.floor((pad_to_size - sig_len) / 2)
        r_pad = math.ceil((pad_to_size - sig_len) / 2)
        sig = np.pad(sig, (l_pad, r_pad))
        filters.append(sig)
    return np.stack(filters, axis=0), lengths


def build_vqt_octaves(sample_rate, hop_length, f_min, n_bins, gamma, bins_per_octave):
    """Per-octave parameters (highest octave first).  The onesided rDFT is folded
    into the complex filterbank (valid because the STFT window is all-ones), then
    Re/Im halves are stacked into one LHS padded to a multiple of 8 sublanes."""
    n_filters = min(bins_per_octave, n_bins)
    freqs, n_octaves = frequency_set(f_min, n_bins, bins_per_octave)
    alpha = relative_bandwidths(freqs, n_bins, bins_per_octave)
    _, cutoff_freq = wavelet_lengths(freqs, sample_rate, alpha, gamma)
    nyquist = sample_rate / 2.0
    if cutoff_freq > nyquist:
        raise ValueError("cutoff frequency above Nyquist; reduce n_bins")

    octaves = []
    temp_sr, temp_hop = float(sample_rate), hop_length
    for oct_index in range(n_octaves - 1, -1, -1):
        sl = slice(n_filters * oct_index, n_filters * (oct_index + 1))
        octave_freqs = freqs[sl]
        octave_alphas = alpha[sl]
        basis, lengths = wavelet_fbank(octave_freqs, temp_sr, octave_alphas, gamma)
        n_fft = basis.shape[1]
        basis = basis * (lengths[:, None] / float(n_fft))
        fft_basis = np.fft.fft(basis, n=n_fft, axis=1)[:, : n_fft // 2 + 1]
        fft_basis = fft_basis * math.sqrt(sample_rate / temp_sr)
        # Fold the onesided rDFT into the basis:
        #   C[i, n] = sum_{j=0}^{n_fft//2} fft_basis[i, j] * exp(-2*pi*i*j*n / n_fft)
        j = np.arange(n_fft // 2 + 1, dtype=np.float64)
        n = np.arange(n_fft, dtype=np.float64)
        E = np.exp(-2j * np.pi * np.outer(j, n) / n_fft)
        C = fft_basis @ E
        nf = C.shape[0]
        p_pad = _round_up(nf, 8)
        stacked = np.zeros((2 * p_pad, n_fft), dtype=np.float32)
        stacked[:nf, :] = C.real.astype(np.float32)
        stacked[p_pad:p_pad + nf, :] = C.imag.astype(np.float32)
        octaves.append(dict(
            basis_stacked=stacked,        # (2*p_pad, n_fft) float32
            n_filters=int(nf),
            p_pad=int(p_pad),
            hop=int(temp_hop),
            n_fft=int(n_fft),
            resample_after=(temp_hop % 2 == 0),
        ))
        if temp_hop % 2 == 0:
            temp_sr /= 2.0
            temp_hop //= 2
    return octaves


def build_resample_kernel():
    """torchaudio Resample(2, 1, 'sinc_interp_hann') kernel (defaults)."""
    orig_freq, new_freq = 2, 1
    lowpass_filter_width = 6
    rolloff = 0.99
    base_freq = min(orig_freq, new_freq) * rolloff
    width = math.ceil(lowpass_filter_width * orig_freq / base_freq)
    idx = np.arange(-width, width + orig_freq, dtype=np.float64) / orig_freq
    t = (np.arange(0, -new_freq, -1, dtype=np.float64)[:, None] / new_freq) + idx[None, :]
    t = t * base_freq
    t = np.clip(t, -lowpass_filter_width, lowpass_filter_width)
    window = np.cos(t * np.pi / lowpass_filter_width / 2.0) ** 2
    t = t * np.pi
    scale = base_freq / orig_freq
    kernel = np.where(t == 0.0, 1.0, np.sin(t) / np.where(t == 0.0, 1.0, t)) * window * scale
    return np.asarray(kernel[0], dtype=np.float32), width  # (2*width + orig_freq,)


# ---------------------------------------------------------------------------
# Plain-JAX glue: half-band resampling and (fallback-only) framing.
# ---------------------------------------------------------------------------
def resample_by_2(x, kernel, width):
    """torchaudio._apply_sinc_resample_kernel for orig=2, new=1 via strided conv.
    x: (BC, L) float32."""
    orig_freq, new_freq = 2, 1
    L = x.shape[-1]
    xpad = jnp.pad(x, ((0, 0), (width, width + orig_freq)))
    y = lax.conv_general_dilated(
        xpad[:, None, :], kernel[None, None, :],
        window_strides=(orig_freq,), padding="VALID",
        dimension_numbers=("NCH", "OIH", "NCH"))[:, 0, :]
    target = math.ceil(new_freq * L / orig_freq)
    return y[:, :target]


def frame_signal_lane_dense(xb, n_fft, hop, n_frames, total_pad):
    """torch.stft framing (center=True, pad_mode='constant', window=ones) gathered
    directly into the lane-dense (n_fft, total_pad) layout, in bf16.
    Column c = bc * n_frames + f.  Pad columns (c >= BC*n_frames) repeat valid data
    (clamped indices); they are sliced off by the caller."""
    BC, _ = xb.shape
    pad = n_fft // 2
    xpad = jnp.pad(xb, ((0, 0), (pad, pad)))
    cols = jnp.arange(total_pad)
    bc_idx = jnp.minimum(cols // n_frames, BC - 1)
    f_idx = cols % n_frames
    time_idx = f_idx[None, :] * hop + jnp.arange(n_fft)[:, None]   # (n_fft, total_pad)
    return xpad[bc_idx[None, :], time_idx]                          # bf16 gather


# ---------------------------------------------------------------------------
# Tiling helpers.
# ---------------------------------------------------------------------------
def _choose_tile(total, tile_max, min_tiles=1):
    """Pick (tile, padded_total): tile is a multiple of 128 <= tile_max, padded_total a
    multiple of tile >= total.  Prefers (a) >= min_tiles grid steps (so v7x's two
    TensorCores both get work), (b) bounded padding waste, (c) the largest tile."""
    base = _round_up(total, 128)
    slack = base // 8 + 128
    best = None
    for tile in range(128, min(tile_max, base) + 1, 128):
        padded = _round_up(total, tile)
        n_tiles = padded // tile
        key = (n_tiles >= min_tiles, (padded - total) <= slack, tile, -padded)
        if best is None or key > best[1]:
            best = ((tile, padded), key)
    return best[0]


def _tile_max(per_col_bytes, cap, budget):
    t = (budget // per_col_bytes) // 128 * 128
    return int(min(cap, max(128, t)))


# ---------------------------------------------------------------------------
# Shared in-kernel post-processing (magnitude/power/logC/z-norm).
# ---------------------------------------------------------------------------
def _postprocess(acc, p_pad, power, logC, mean, inv_std):
    re = acc[:p_pad, :]                      # aligned (8-sublane-multiple) slices
    im = acc[p_pad:, :]
    mag_sq = re * re + im * im
    if power == 2:
        out = mag_sq                         # |.|**2 without the sqrt
    elif power > 1 and power % 2 == 0:
        out = mag_sq ** (power // 2)
    elif power > 1:
        out = mag_sq ** (0.5 * power)
    else:
        out = jnp.sqrt(mag_sq)               # magnitude only
    if logC:
        out = jnp.log10(1.0 + 10000.0 * out)
    if mean is not None and inv_std is not None:
        out = (out - mean) * inv_std
    return out


# ---------------------------------------------------------------------------
# Pallas kernels.
# ---------------------------------------------------------------------------
def _make_stream_kernel(K, tile_f, p_pad, power, logC, mean, inv_std):
    def kernel(basis_ref, sa_ref, sb_ref, o_ref):
        # In-kernel framing: two adjacent hop-group blocks of the signal give K-1
        # columns of lookahead; frame f needs hop-groups f..f+K-1.
        sig = jnp.concatenate([sa_ref[0], sb_ref[0]], axis=-1)        # (hop, 2*tile_f) bf16
        acc = None
        for k in range(K):                                            # K = n_fft // hop, unrolled
            part = jnp.dot(basis_ref[k], sig[:, k:k + tile_f],
                           preferred_element_type=jnp.float32)        # (2*p_pad, tile_f) f32
            acc = part if acc is None else acc + part
        o_ref[0] = _postprocess(acc, p_pad, power, logC, mean, inv_std).astype(o_ref.dtype)
    return kernel


def cqt_octave_stream(basis_chunks, sigT, *, p_pad, f_pad, tile_f,
                      power, logC, mean, std):
    """basis_chunks: (K, 2*p_pad, hop) bf16; sigT: (BC, hop, cols) bf16 with
    cols = (f_pad // tile_f + 1) * tile_f.  Returns (BC, p_pad, f_pad) float32."""
    K, p2, hop = basis_chunks.shape
    BC = sigT.shape[0]
    num_tiles = f_pad // tile_f
    n_fft = K * hop
    inv_std = None if std is None else 1.0 / std
    kernel = _make_stream_kernel(K, tile_f, p_pad, power, logC, mean, inv_std)

    flops = 2 * p2 * n_fft * BC * f_pad
    transc = (p_pad * BC * f_pad) if logC else 0
    bytes_accessed = (2 * sigT.size * sigT.dtype.itemsize        # each block read twice
                      + basis_chunks.size * basis_chunks.dtype.itemsize
                      + BC * p_pad * f_pad * 4)

    return pl.pallas_call(
        kernel,
        out_shape=jax.ShapeDtypeStruct((BC, p_pad, f_pad), jnp.float32),
        grid=(BC, num_tiles),
        in_specs=[
            # constant index_map -> fetched once, stays resident across the grid
            pl.BlockSpec((K, p2, hop), lambda b, t: (0, 0, 0)),
            pl.BlockSpec((1, hop, tile_f), lambda b, t: (b, 0, t)),
            pl.BlockSpec((1, hop, tile_f), lambda b, t: (b, 0, t + 1)),
        ],
        out_specs=pl.BlockSpec((1, p_pad, tile_f), lambda b, t: (b, 0, t)),
        compiler_params=pltpu.CompilerParams(
            dimension_semantics=("parallel", "parallel")),
        cost_estimate=pl.CostEstimate(flops=int(flops), transcendentals=int(transc),
                                      bytes_accessed=int(bytes_accessed)),
    )(basis_chunks, sigT, sigT)


def _make_framed_kernel(p_pad, power, logC, mean, inv_std):
    def kernel(basis_ref, frames_ref, o_ref):
        acc = jnp.dot(basis_ref[...], frames_ref[...],
                      preferred_element_type=jnp.float32)             # (2*p_pad, tile_n) f32
        o_ref[...] = _postprocess(acc, p_pad, power, logC, mean, inv_std).astype(o_ref.dtype)
    return kernel


def cqt_octave_framed(basis_stacked, frames2d, *, p_pad, tile_n,
                      power, logC, mean, std):
    """Fallback when hop does not divide n_fft (or hop >= n_fft).
    basis_stacked: (2*p_pad, n_fft) bf16; frames2d: (n_fft, total_pad) bf16."""
    p2, n_fft = basis_stacked.shape
    total = frames2d.shape[1]
    num_tiles = total // tile_n
    inv_std = None if std is None else 1.0 / std
    kernel = _make_framed_kernel(p_pad, power, logC, mean, inv_std)

    flops = 2 * p2 * n_fft * total
    transc = (p_pad * total) if logC else 0
    bytes_accessed = (frames2d.size * frames2d.dtype.itemsize
                      + basis_stacked.size * basis_stacked.dtype.itemsize
                      + p_pad * total * 4)

    return pl.pallas_call(
        kernel,
        out_shape=jax.ShapeDtypeStruct((p_pad, total), jnp.float32),
        grid=(num_tiles,),
        in_specs=[pl.BlockSpec((p2, n_fft), lambda t: (0, 0)),        # resident basis
                  pl.BlockSpec((n_fft, tile_n), lambda t: (0, t))],   # lane-dense frame tiles
        out_specs=pl.BlockSpec((p_pad, tile_n), lambda t: (0, t)),
        compiler_params=pltpu.CompilerParams(dimension_semantics=("parallel",)),
        cost_estimate=pl.CostEstimate(flops=int(flops), transcendentals=int(transc),
                                      bytes_accessed=int(bytes_accessed)),
    )(basis_stacked, frames2d)


# ---------------------------------------------------------------------------
# CQT module (JAX / Pallas version).
# ---------------------------------------------------------------------------
class CQTPallas:
    TILE_MAX = 2048              # max lane-tile width (multiple of 128)
    VMEM_BUDGET = 10 << 20       # per-call pipelined working-set budget (fits default scoped VMEM)
    MAX_STREAM_K = 64            # cap on n_fft//hop for the in-kernel-framing path

    def __init__(self, sr, hop_len, power, bins_per_octave, n_bins, f_min,
                 magnitude, logC, norm_mean, norm_std, patch_size=(1, 1)):
        assert magnitude, "only magnitude=True path is implemented"
        # TODO(synk): complex-output (magnitude=False) path is not implemented in the kernel.
        self.power = power
        self.logC = logC
        self.mean = norm_mean
        self.std = norm_std
        self.octaves = build_vqt_octaves(sr, hop_len, f_min, n_bins,
                                         gamma=0.0, bins_per_octave=bins_per_octave)
        k, w = build_resample_kernel()
        self.resample_kernel = jnp.asarray(k)
        self.resample_width = w

        # bf16 bases (MXU-native); accumulation stays f32 in-kernel.
        # TODO(synk): if validation vs an f32 torch reference shows too much error,
        # switch the basis to f32 (signal stays bf16) -- the kernel is HBM-bound.
        self.basis = []
        for o in self.octaves:
            hop, n_fft, p2 = o["hop"], o["n_fft"], 2 * o["p_pad"]
            K = n_fft // hop if (hop > 0 and n_fft % hop == 0) else 0
            o["use_stream"] = bool(hop < n_fft and n_fft % hop == 0
                                   and 2 <= K <= self.MAX_STREAM_K)
            b = o["basis_stacked"]
            if o["use_stream"]:
                # Split into K hop-wide chunks: basis_k[p, r] = stacked[p, k*hop + r]
                b = b.reshape(p2, K, hop).transpose(1, 0, 2)          # (K, 2*p_pad, hop)
            self.basis.append(jnp.asarray(b, dtype=jnp.bfloat16))

        self._forward = jax.jit(self._forward_impl)

    # -- per-octave paths --------------------------------------------------
    def _octave_stream(self, basis, xb, oct_p, n_frames, BC):
        hop, n_fft, p_pad = oct_p["hop"], oct_p["n_fft"], oct_p["p_pad"]
        nf = oct_p["n_filters"]
        T = xb.shape[-1]
        pad = n_fft // 2
        per_col_bytes = 8 * hop + 8 * p_pad        # double-buffered sig blocks + f32 out
        tile_f, f_pad = _choose_tile(n_frames,
                                     _tile_max(per_col_bytes, self.TILE_MAX, self.VMEM_BUDGET),
                                     min_tiles=2 if BC < 2 else 1)
        num_tiles = f_pad // tile_f
        cols = (num_tiles + 1) * tile_f            # one extra block of lookahead columns
        total_len = cols * hop
        xp = jnp.pad(xb, ((0, 0), (pad, total_len - T - pad)))
        # hop-group layout: sigT[bc, r, g] = x_padded[bc, g*hop + r]
        sigT = jnp.transpose(xp.reshape(BC, cols, hop), (0, 2, 1))    # (BC, hop, cols) bf16
        out = cqt_octave_stream(basis, sigT, p_pad=p_pad, f_pad=f_pad, tile_f=tile_f,
                                power=self.power, logC=self.logC,
                                mean=self.mean, std=self.std)
        return out[:, :nf, :]                      # (BC, nf, f_pad)

    def _octave_framed(self, basis, xb, oct_p, n_frames, BC):
        hop, n_fft, p_pad = oct_p["hop"], oct_p["n_fft"], oct_p["p_pad"]
        nf = oct_p["n_filters"]
        total = BC * n_frames
        per_col_bytes = 4 * n_fft + 8 * p_pad
        tile_n, total_pad = _choose_tile(total,
                                         _tile_max(per_col_bytes, self.TILE_MAX, self.VMEM_BUDGET),
                                         min_tiles=2)
        frames2d = frame_signal_lane_dense(xb, n_fft, hop, n_frames, total_pad)
        out = cqt_octave_framed(basis, frames2d, p_pad=p_pad, tile_n=tile_n,
                                power=self.power, logC=self.logC,
                                mean=self.mean, std=self.std)
        out = out[:nf, :total].reshape(nf, BC, n_frames)
        return jnp.transpose(out, (1, 0, 2))       # (BC, nf, n_frames)

    # -- forward -------------------------------------------------------------
    def _forward_impl(self, waveform):
        """waveform: (..., channels, time) -> (..., channels, n_bins, n_frames)."""
        lead_shape = waveform.shape[:-1]
        x = waveform.reshape(-1, waveform.shape[-1]).astype(jnp.float32)
        BC = x.shape[0]
        outs = []
        n_oct = len(self.octaves)
        for i, oct_p in enumerate(self.octaves):
            hop, n_fft = oct_p["hop"], oct_p["n_fft"]
            T = x.shape[-1]
            pad = n_fft // 2
            n_frames = 1 + (T + 2 * pad - n_fft) // hop
            xb = x.astype(jnp.bfloat16)            # cast BEFORE any framing / reshape
            if oct_p["use_stream"]:
                out = self._octave_stream(self.basis[i], xb, oct_p, n_frames, BC)
            else:
                out = self._octave_framed(self.basis[i], xb, oct_p, n_frames, BC)
            outs.append(out[..., :n_frames])
            if oct_p["resample_after"] and i < n_oct - 1:
                x = resample_by_2(x, self.resample_kernel, self.resample_width)
                x = x / math.sqrt(0.5)
        # Octaves were processed highest-first; torch prepends each new (lower)
        # octave, so final bin order is ascending frequency.
        cqt = jnp.concatenate(list(reversed(outs)), axis=-2)
        return cqt.reshape(lead_shape + cqt.shape[-2:])

    def __call__(self, waveform):
        return self._forward(waveform)


# ---------------------------------------------------------------------------
if __name__ == "__main__":
    # Small deterministic config: 2 octaves, 24 bins, 12 bins/octave.
    sr = 4000
    hop_len = 64
    n_bins = 24
    bins_per_octave = 12
    f_min = 200.0

    cqt = CQTPallas(sr=sr, hop_len=hop_len, power=2, bins_per_octave=bins_per_octave,
                    n_bins=n_bins, f_min=f_min, magnitude=True, logC=True,
                    norm_mean=0.5, norm_std=2.0, patch_size=(4, 4))

    key = jax.random.PRNGKey(0)
    batch, channels, time = 2, 2, 1024
    waveform = jax.random.normal(key, (batch, channels, time), dtype=jnp.float32)

    out = cqt(waveform)
    out = jax.block_until_ready(out)

    expected_frames = time // hop_len + 1
    assert out.shape == (batch, channels, n_bins, expected_frames), out.shape
    assert out.dtype == jnp.float32
    assert bool(jnp.all(jnp.isfinite(out)))
    print("KERNEL_OK")
</pallas_src>

<mosaic_0001>
module attributes {stable_mosaic.version = 11 : i64} {
  func.func @kernel(%arg0: i32, %arg1: i32, %arg2: memref<8x32x32xbf16, #tpu.memory_space<vmem>>, %arg3: memref<1x32x128xbf16, #tpu.memory_space<vmem>>, %arg4: memref<1x32x128xbf16, #tpu.memory_space<vmem>>, %arg5: memref<1x16x128xf32, #tpu.memory_space<vmem>>) attributes {dimension_semantics = [#tpu.dimension_semantics<parallel>, #tpu.dimension_semantics<parallel>], iteration_bounds = array<i64: 4, 1>, scalar_prefetch = 0 : i64, scratch_operands = 0 : i64, tpu.core_type = #tpu.core_type<tc>, window_params = [{pipeline_mode = #tpu.pipeline_mode<synchronous>, transform_indices = @transform_0, window_bounds = array<i64: 8, 32, 32>}, {transform_indices = @transform_1, window_bounds = array<i64: 1, 32, 128>}, {transform_indices = @transform_2, window_bounds = array<i64: 1, 32, 128>}, {transform_indices = @transform_3, window_bounds = array<i64: 1, 16, 128>}]} {
    %c0 = arith.constant 0 : index
    %c0_0 = arith.constant 0 : index
    %c0_1 = arith.constant 0 : index
    %0 = vector.load %arg3[%c0, %c0_0, %c0_1] : memref<1x32x128xbf16, #tpu.memory_space<vmem>>, vector<1x32x128xbf16>
    %1 = vector.shape_cast %0 : vector<1x32x128xbf16> to vector<32x128xbf16>
    %c0_2 = arith.constant 0 : index
    %c0_3 = arith.constant 0 : index
    %c0_4 = arith.constant 0 : index
    %2 = vector.load %arg4[%c0_2, %c0_3, %c0_4] : memref<1x32x128xbf16, #tpu.memory_space<vmem>>, vector<1x32x128xbf16>
    %3 = vector.shape_cast %2 : vector<1x32x128xbf16> to vector<32x128xbf16>
    %4 = tpu.concatenate %1, %3 in 1 : vector<32x128xbf16>, vector<32x128xbf16> -> vector<32x256xbf16>
    %c0_5 = arith.constant 0 : index
    %c0_6 = arith.constant 0 : index
    %c0_7 = arith.constant 0 : index
    %5 = vector.load %arg2[%c0_5, %c0_6, %c0_7] : memref<8x32x32xbf16, #tpu.memory_space<vmem>>, vector<1x32x32xbf16>
    %6 = vector.shape_cast %5 : vector<1x32x32xbf16> to vector<32x32xbf16>
    %7 = vector.extract_strided_slice %4 {offsets = [0, 0], sizes = [32, 128], strides = [1, 1]} : vector<32x256xbf16> to vector<32x128xbf16>
    %cst = arith.constant dense<0.000000e+00> : vector<32x128xf32>
    %8 = tpu.matmul %6, %7, %cst {dimension_numbers = #tpu.dot_dimension_numbers<[1], [0], [0], [1], [0, 0, 1, 1], [], []>} : vector<32x32xbf16>, vector<32x128xbf16>, vector<32x128xf32> -> vector<32x128xf32>
    %c1 = arith.constant 1 : index
    %c0_8 = arith.constant 0 : index
    %c0_9 = arith.constant 0 : index
    %9 = vector.load %arg2[%c1, %c0_8, %c0_9] : memref<8x32x32xbf16, #tpu.memory_space<vmem>>, vector<1x32x32xbf16>
    %10 = vector.shape_cast %9 : vector<1x32x32xbf16> to vector<32x32xbf16>
    %11 = vector.extract_strided_slice %4 {offsets = [0, 1], sizes = [32, 128], strides = [1, 1]} : vector<32x256xbf16> to vector<32x128xbf16>
    %cst_10 = arith.constant dense<0.000000e+00> : vector<32x128xf32>
    %12 = tpu.matmul %10, %11, %cst_10 {dimension_numbers = #tpu.dot_dimension_numbers<[1], [0], [0], [1], [0, 0, 1, 1], [], []>} : vector<32x32xbf16>, vector<32x128xbf16>, vector<32x128xf32> -> vector<32x128xf32>
    %13 = arith.addf %8, %12 : vector<32x128xf32>
    %c2 = arith.constant 2 : index
    %c0_11 = arith.constant 0 : index
    %c0_12 = arith.constant 0 : index
    %14 = vector.load %arg2[%c2, %c0_11, %c0_12] : memref<8x32x32xbf16, #tpu.memory_space<vmem>>, vector<1x32x32xbf16>
    %15 = vector.shape_cast %14 : vector<1x32x32xbf16> to vector<32x32xbf16>
    %16 = vector.extract_strided_slice %4 {offsets = [0, 2], sizes = [32, 128], strides = [1, 1]} : vector<32x256xbf16> to vector<32x128xbf16>
    %cst_13 = arith.constant dense<0.000000e+00> : vector<32x128xf32>
    %17 = tpu.matmul %15, %16, %cst_13 {dimension_numbers = #tpu.dot_dimension_numbers<[1], [0], [0], [1], [0, 0, 1, 1], [], []>} : vector<32x32xbf16>, vector<32x128xbf16>, vector<32x128xf32> -> vector<32x128xf32>
    %18 = arith.addf %13, %17 : vector<32x128xf32>
    %c3 = arith.constant 3 : index
    %c0_14 = arith.constant 0 : index
    %c0_15 = arith.constant 0 : index
    %19 = vector.load %arg2[%c3, %c0_14, %c0_15] : memref<8x32x32xbf16, #tpu.memory_space<vmem>>, vector<1x32x32xbf16>
    %20 = vector.shape_cast %19 : vector<1x32x32xbf16> to vector<32x32xbf16>
    %21 = vector.extract_strided_slice %4 {offsets = [0, 3], sizes = [32, 128], strides = [1, 1]} : vector<32x256xbf16> to vector<32x128xbf16>
    %cst_16 = arith.constant dense<0.000000e+00> : vector<32x128xf32>
    %22 = tpu.matmul %20, %21, %cst_16 {dimension_numbers = #tpu.dot_dimension_numbers<[1], [0], [0], [1], [0, 0, 1, 1], [], []>} : vector<32x32xbf16>, vector<32x128xbf16>, vector<32x128xf32> -> vector<32x128xf32>
    %23 = arith.addf %18, %22 : vector<32x128xf32>
    %c4 = arith.constant 4 : index
    %c0_17 = arith.constant 0 : index
    %c0_18 = arith.constant 0 : index
    %24 = vector.load %arg2[%c4, %c0_17, %c0_18] : memref<8x32x32xbf16, #tpu.memory_space<vmem>>, vector<1x32x32xbf16>
    %25 = vector.shape_cast %24 : vector<1x32x32xbf16> to vector<32x32xbf16>
    %26 = vector.extract_strided_slice %4 {offsets = [0, 4], sizes = [32, 128], strides = [1, 1]} : vector<32x256xbf16> to vector<32x128xbf16>
    %cst_19 = arith.constant dense<0.000000e+00> : vector<32x128xf32>
    %27 = tpu.matmul %25, %26, %cst_19 {dimension_numbers = #tpu.dot_dimension_numbers<[1], [0], [0], [1], [0, 0, 1, 1], [], []>} : vector<32x32xbf16>, vector<32x128xbf16>, vector<32x128xf32> -> vector<32x128xf32>
    %28 = arith.addf %23, %27 : vector<32x128xf32>
    %c5 = arith.constant 5 : index
    %c0_20 = arith.constant 0 : index
    %c0_21 = arith.constant 0 : index
    %29 = vector.load %arg2[%c5, %c0_20, %c0_21] : memref<8x32x32xbf16, #tpu.memory_space<vmem>>, vector<1x32x32xbf16>
    %30 = vector.shape_cast %29 : vector<1x32x32xbf16> to vector<32x32xbf16>
    %31 = vector.extract_strided_slice %4 {offsets = [0, 5], sizes = [32, 128], strides = [1, 1]} : vector<32x256xbf16> to vector<32x128xbf16>
    %cst_22 = arith.constant dense<0.000000e+00> : vector<32x128xf32>
    %32 = tpu.matmul %30, %31, %cst_22 {dimension_numbers = #tpu.dot_dimension_numbers<[1], [0], [0], [1], [0, 0, 1, 1], [], []>} : vector<32x32xbf16>, vector<32x128xbf16>, vector<32x128xf32> -> vector<32x128xf32>
    %33 = arith.addf %28, %32 : vector<32x128xf32>
    %c6 = arith.constant 6 : index
    %c0_23 = arith.constant 0 : index
    %c0_24 = arith.constant 0 : index
    %34 = vector.load %arg2[%c6, %c0_23, %c0_24] : memref<8x32x32xbf16, #tpu.memory_space<vmem>>, vector<1x32x32xbf16>
    %35 = vector.shape_cast %34 : vector<1x32x32xbf16> to vector<32x32xbf16>
    %36 = vector.extract_strided_slice %4 {offsets = [0, 6], sizes = [32, 128], strides = [1, 1]} : vector<32x256xbf16> to vector<32x128xbf16>
    %cst_25 = arith.constant dense<0.000000e+00> : vector<32x128xf32>
    %37 = tpu.matmul %35, %36, %cst_25 {dimension_numbers = #tpu.dot_dimension_numbers<[1], [0], [0], [1], [0, 0, 1, 1], [], []>} : vector<32x32xbf16>, vector<32x128xbf16>, vector<32x128xf32> -> vector<32x128xf32>
    %38 = arith.addf %33, %37 : vector<32x128xf32>
    %c7 = arith.constant 7 : index
    %c0_26 = arith.constant 0 : index
    %c0_27 = arith.constant 0 : index
    %39 = vector.load %arg2[%c7, %c0_26, %c0_27] : memref<8x32x32xbf16, #tpu.memory_space<vmem>>, vector<1x32x32xbf16>
    %40 = vector.shape_cast %39 : vector<1x32x32xbf16> to vector<32x32xbf16>
    %41 = vector.extract_strided_slice %4 {offsets = [0, 7], sizes = [32, 128], strides = [1, 1]} : vector<32x256xbf16> to vector<32x128xbf16>
    %cst_28 = arith.constant dense<0.000000e+00> : vector<32x128xf32>
    %42 = tpu.matmul %40, %41, %cst_28 {dimension_numbers = #tpu.dot_dimension_numbers<[1], [0], [0], [1], [0, 0, 1, 1], [], []>} : vector<32x32xbf16>, vector<32x128xbf16>, vector<32x128xf32> -> vector<32x128xf32>
    %43 = arith.addf %38, %42 : vector<32x128xf32>
    %44 = vector.extract_strided_slice %43 {offsets = [0, 0], sizes = [16, 128], strides = [1, 1]} : vector<32x128xf32> to vector<16x128xf32>
    %45 = vector.extract_strided_slice %43 {offsets = [16, 0], sizes = [16, 128], strides = [1, 1]} : vector<32x128xf32> to vector<16x128xf32>
    %46 = arith.mulf %44, %44 : vector<16x128xf32>
    %47 = arith.mulf %45, %45 : vector<16x128xf32>
    %48 = arith.addf %46, %47 : vector<16x128xf32>
    %cst_29 = arith.constant 1.000000e+04 : f32
    %49 = vector.broadcast %cst_29 : f32 to vector<16x128xf32>
    %50 = arith.mulf %49, %48 : vector<16x128xf32>
    %cst_30 = arith.constant 1.000000e+00 : f32
    %51 = vector.broadcast %cst_30 : f32 to vector<16x128xf32>
    %52 = arith.addf %51, %50 : vector<16x128xf32>
    %53 = math.log %52 : vector<16x128xf32>
    %cst_31 = arith.constant 0.434294492 : f32
    %54 = vector.broadcast %cst_31 : f32 to vector<16x128xf32>
    %55 = arith.mulf %53, %54 : vector<16x128xf32>
    %cst_32 = arith.constant 5.000000e-01 : f32
    %56 = vector.broadcast %cst_32 : f32 to vector<16x128xf32>
    %57 = arith.subf %55, %56 : vector<16x128xf32>
    %cst_33 = arith.constant 5.000000e-01 : f32
    %58 = vector.broadcast %cst_33 : f32 to vector<16x128xf32>
    %59 = arith.mulf %57, %58 : vector<16x128xf32>
    %c0_34 = arith.constant 0 : index
    %c0_35 = arith.constant 0 : index
    %c0_36 = arith.constant 0 : index
    %60 = vector.load %arg5[%c0_34, %c0_35, %c0_36] : memref<1x16x128xf32, #tpu.memory_space<vmem>>, vector<1x16x128xf32>
    %61 = vector.shape_cast %60 : vector<1x16x128xf32> to vector<16x128xf32>
    %62 = vector.shape_cast %59 : vector<16x128xf32> to vector<1x16x128xf32>
    tpu.vector_store %arg5[%c0_34, %c0_35, %c0_36], %62 {strides = array<i32>} : memref<1x16x128xf32, #tpu.memory_space<vmem>>, vector<1x16x128xf32>,
    return
  }
  func.func @transform_0(%arg0: i32, %arg1: i32) -> (i32, i32, i32) {
    %c0_i32 = arith.constant 0 : i32
    %c0_i32_0 = arith.constant 0 : i32
    %c0_i32_1 = arith.constant 0 : i32
    %c0_i32_2 = arith.constant 0 : i32
    return %c0_i32, %c0_i32_0, %c0_i32_1 : i32, i32, i32
  }
  func.func @transform_1(%arg0: i32, %arg1: i32) -> (i32, i32, i32) {
    %c0_i32 = arith.constant 0 : i32
    %c0_i32_0 = arith.constant 0 : i32
    return %arg0, %c0_i32, %arg1 : i32, i32, i32
  }
  func.func @transform_2(%arg0: i32, %arg1: i32) -> (i32, i32, i32) {
    %c1_i32 = arith.constant 1 : i32
    %0 = arith.addi %arg1, %c1_i32 : i32
    %c0_i32 = arith.constant 0 : i32
    %c0_i32_0 = arith.constant 0 : i32
    return %arg0, %c0_i32, %0 : i32, i32, i32
  }
  func.func @transform_3(%arg0: i32, %arg1: i32) -> (i32, i32, i32) {
    %c0_i32 = arith.constant 0 : i32
    %c0_i32_0 = arith.constant 0 : i32
    return %arg0, %c0_i32, %arg1 : i32, i32, i32
  }
}

module attributes {stable_mosaic.version = 11 : i64} {
  func.func @kernel(%arg0: i32, %arg1: i32, %arg2: memref<4x32x64xbf16, #tpu.memory_space<vmem>>, %arg3: memref<1x64x128xbf16, #tpu.memory_space<vmem>>, %arg4: memref<1x64x128xbf16, #tpu.memory_space<vmem>>, %arg5: memref<1x16x128xf32, #tpu.memory_space<vmem>>) attributes {dimension_semantics = [#tpu.dimension_semantics<parallel>, #tpu.dimension_semantics<parallel>], iteration_bounds = array<i64: 4, 1>, scalar_prefetch = 0 : i64, scratch_operands = 0 : i64, tpu.core_type = #tpu.core_type<tc>, window_params = [{pipeline_mode = #tpu.pipeline_mode<synchronous>, transform_indices = @transform_0, window_bounds = array<i64: 4, 32, 64>}, {transform_indices = @transform_1, window_bounds = array<i64: 1, 64, 128>}, {transform_indices = @transform_2, window_bounds = array<i64: 1, 64, 128>}, {transform_indices = @transform_3, window_bounds = array<i64: 1, 16, 128>}]} {
    %c0 = arith.constant 0 : index
    %c0_0 = arith.constant 0 : index
    %c0_1 = arith.constant 0 : index
    %0 = vector.load %arg3[%c0, %c0_0, %c0_1] : memref<1x64x128xbf16, #tpu.memory_space<vmem>>, vector<1x64x128xbf16>
    %1 = vector.shape_cast %0 : vector<1x64x128xbf16> to vector<64x128xbf16>
    %c0_2 = arith.constant 0 : index
    %c0_3 = arith.constant 0 : index
    %c0_4 = arith.constant 0 : index
    %2 = vector.load %arg4[%c0_2, %c0_3, %c0_4] : memref<1x64x128xbf16, #tpu.memory_space<vmem>>, vector<1x64x128xbf16>
    %3 = vector.shape_cast %2 : vector<1x64x128xbf16> to vector<64x128xbf16>
    %4 = tpu.concatenate %1, %3 in 1 : vector<64x128xbf16>, vector<64x128xbf16> -> vector<64x256xbf16>
    %c0_5 = arith.constant 0 : index
    %c0_6 = arith.constant 0 : index
    %c0_7 = arith.constant 0 : index
    %5 = vector.load %arg2[%c0_5, %c0_6, %c0_7] : memref<4x32x64xbf16, #tpu.memory_space<vmem>>, vector<1x32x64xbf16>
    %6 = vector.shape_cast %5 : vector<1x32x64xbf16> to vector<32x64xbf16>
    %7 = vector.extract_strided_slice %4 {offsets = [0, 0], sizes = [64, 128], strides = [1, 1]} : vector<64x256xbf16> to vector<64x128xbf16>
    %cst = arith.constant dense<0.000000e+00> : vector<32x128xf32>
    %8 = tpu.matmul %6, %7, %cst {dimension_numbers = #tpu.dot_dimension_numbers<[1], [0], [0], [1], [0, 0, 1, 1], [], []>} : vector<32x64xbf16>, vector<64x128xbf16>, vector<32x128xf32> -> vector<32x128xf32>
    %c1 = arith.constant 1 : index
    %c0_8 = arith.constant 0 : index
    %c0_9 = arith.constant 0 : index
    %9 = vector.load %arg2[%c1, %c0_8, %c0_9] : memref<4x32x64xbf16, #tpu.memory_space<vmem>>, vector<1x32x64xbf16>
    %10 = vector.shape_cast %9 : vector<1x32x64xbf16> to vector<32x64xbf16>
    %11 = vector.extract_strided_slice %4 {offsets = [0, 1], sizes = [64, 128], strides = [1, 1]} : vector<64x256xbf16> to vector<64x128xbf16>
    %cst_10 = arith.constant dense<0.000000e+00> : vector<32x128xf32>
    %12 = tpu.matmul %10, %11, %cst_10 {dimension_numbers = #tpu.dot_dimension_numbers<[1], [0], [0], [1], [0, 0, 1, 1], [], []>} : vector<32x64xbf16>, vector<64x128xbf16>, vector<32x128xf32> -> vector<32x128xf32>
    %13 = arith.addf %8, %12 : vector<32x128xf32>
    %c2 = arith.constant 2 : index
    %c0_11 = arith.constant 0 : index
    %c0_12 = arith.constant 0 : index
    %14 = vector.load %arg2[%c2, %c0_11, %c0_12] : memref<4x32x64xbf16, #tpu.memory_space<vmem>>, vector<1x32x64xbf16>
    %15 = vector.shape_cast %14 : vector<1x32x64xbf16> to vector<32x64xbf16>
    %16 = vector.extract_strided_slice %4 {offsets = [0, 2], sizes = [64, 128], strides = [1, 1]} : vector<64x256xbf16> to vector<64x128xbf16>
    %cst_13 = arith.constant dense<0.000000e+00> : vector<32x128xf32>
    %17 = tpu.matmul %15, %16, %cst_13 {dimension_numbers = #tpu.dot_dimension_numbers<[1], [0], [0], [1], [0, 0, 1, 1], [], []>} : vector<32x64xbf16>, vector<64x128xbf16>, vector<32x128xf32> -> vector<32x128xf32>
    %18 = arith.addf %13, %17 : vector<32x128xf32>
    %c3 = arith.constant 3 : index
    %c0_14 = arith.constant 0 : index
    %c0_15 = arith.constant 0 : index
    %19 = vector.load %arg2[%c3, %c0_14, %c0_15] : memref<4x32x64xbf16, #tpu.memory_space<vmem>>, vector<1x32x64xbf16>
    %20 = vector.shape_cast %19 : vector<1x32x64xbf16> to vector<32x64xbf16>
    %21 = vector.extract_strided_slice %4 {offsets = [0, 3], sizes = [64, 128], strides = [1, 1]} : vector<64x256xbf16> to vector<64x128xbf16>
    %cst_16 = arith.constant dense<0.000000e+00> : vector<32x128xf32>
    %22 = tpu.matmul %20, %21, %cst_16 {dimension_numbers = #tpu.dot_dimension_numbers<[1], [0], [0], [1], [0, 0, 1, 1], [], []>} : vector<32x64xbf16>, vector<64x128xbf16>, vector<32x128xf32> -> vector<32x128xf32>
    %23 = arith.addf %18, %22 : vector<32x128xf32>
    %24 = vector.extract_strided_slice %23 {offsets = [0, 0], sizes = [16, 128], strides = [1, 1]} : vector<32x128xf32> to vector<16x128xf32>
    %25 = vector.extract_strided_slice %23 {offsets = [16, 0], sizes = [16, 128], strides = [1, 1]} : vector<32x128xf32> to vector<16x128xf32>
    %26 = arith.mulf %24, %24 : vector<16x128xf32>
    %27 = arith.mulf %25, %25 : vector<16x128xf32>
    %28 = arith.addf %26, %27 : vector<16x128xf32>
    %cst_17 = arith.constant 1.000000e+04 : f32
    %29 = vector.broadcast %cst_17 : f32 to vector<16x128xf32>
    %30 = arith.mulf %29, %28 : vector<16x128xf32>
    %cst_18 = arith.constant 1.000000e+00 : f32
    %31 = vector.broadcast %cst_18 : f32 to vector<16x128xf32>
    %32 = arith.addf %31, %30 : vector<16x128xf32>
    %33 = math.log %32 : vector<16x128xf32>
    %cst_19 = arith.constant 0.434294492 : f32
    %34 = vector.broadcast %cst_19 : f32 to vector<16x128xf32>
    %35 = arith.mulf %33, %34 : vector<16x128xf32>
    %cst_20 = arith.constant 5.000000e-01 : f32
    %36 = vector.broadcast %cst_20 : f32 to vector<16x128xf32>
    %37 = arith.subf %35, %36 : vector<16x128xf32>
    %cst_21 = arith.constant 5.000000e-01 : f32
    %38 = vector.broadcast %cst_21 : f32 to vector<16x128xf32>
    %39 = arith.mulf %37, %38 : vector<16x128xf32>
    %c0_22 = arith.constant 0 : index
    %c0_23 = arith.constant 0 : index
    %c0_24 = arith.constant 0 : index
    %40 = vector.load %arg5[%c0_22, %c0_23, %c0_24] : memref<1x16x128xf32, #tpu.memory_space<vmem>>, vector<1x16x128xf32>
    %41 = vector.shape_cast %40 : vector<1x16x128xf32> to vector<16x128xf32>
    %42 = vector.shape_cast %39 : vector<16x128xf32> to vector<1x16x128xf32>
    tpu.vector_store %arg5[%c0_22, %c0_23, %c0_24], %42 {strides = array<i32>} : memref<1x16x128xf32, #tpu.memory_space<vmem>>, vector<1x16x128xf32>,
    return
  }
  func.func @transform_0(%arg0: i32, %arg1: i32) -> (i32, i32, i32) {
    %c0_i32 = arith.constant 0 : i32
    %c0_i32_0 = arith.constant 0 : i32
    %c0_i32_1 = arith.constant 0 : i32
    %c0_i32_2 = arith.constant 0 : i32
    return %c0_i32, %c0_i32_0, %c0_i32_1 : i32, i32, i32
  }
  func.func @transform_1(%arg0: i32, %arg1: i32) -> (i32, i32, i32) {
    %c0_i32 = arith.constant 0 : i32
    %c0_i32_0 = arith.constant 0 : i32
    return %arg0, %c0_i32, %arg1 : i32, i32, i32
  }
  func.func @transform_2(%arg0: i32, %arg1: i32) -> (i32, i32, i32) {
    %c1_i32 = arith.constant 1 : i32
    %0 = arith.addi %arg1, %c1_i32 : i32
    %c0_i32 = arith.constant 0 : i32
    %c0_i32_0 = arith.constant 0 : i32
    return %arg0, %c0_i32, %0 : i32, i32, i32
  }
  func.func @transform_3(%arg0: i32, %arg1: i32) -> (i32, i32, i32) {
    %c0_i32 = arith.constant 0 : i32
    %c0_i32_0 = arith.constant 0 : i32
    return %arg0, %c0_i32, %arg1 : i32, i32, i32
  }
}

</mosaic_0001>

<bundles_post_ra>
// kernel: _forward_impl.3
= control target key start
LH: loop header
LB: loop body
LE: loop exit
PB: predicated region body
PF: predicated region fallthrough
CT: control target
= control target key end

     0   :  { %s1491_s12 = smov 0   ;;  %s1493_s13 = smov 0   ;;  %s1646_s0 = inlined_call_operand.vmem [shape: bf16[8,32,32], index: 0, kind: input, shape index: {}]   ;;  %s1647_s1 = inlined_call_operand.vmem [shape: bf16[4,32,256], index: 1, kind: input, shape index: {}, may-alias: {1,2}]   ;;  %s1648_s2 = inlined_call_operand.vmem [shape: bf16[4,32,256], index: 2, kind: input, shape index: {}, may-alias: {1,2}]   ;;  %s1649_s3 = inlined_call_operand.vmem [shape: f32[4,16,128], index: 3, kind: output, shape index: {}]  }
   0x1   :  { %s1495_s14 = smov 0   ;;  %s1497_s15 = smov 0  }
   0x2   :  { %s1499_s16 = smov 0  }
   0x3 LB: > { %s25_s17 = sadd.s32 1, %s1458_s15  ;;  %p62_p1 = scmp.ne.s32.totalorder %s1450_s13, %s1446_s12  ;;  %s1462_s16 = sphi %s1499_s16, %s13_s16   ;;  %s1458_s15 = sphi %s1497_s15, %s1654_s15   ;;  %s1454_s14 = sphi %s1495_s14, %s1653_s14   ;;  %s1450_s13 = sphi %s1493_s13, %s1652_s13   ;;  %s1446_s12 = sphi %s1491_s12, %s1651_s12  }
   0x4   : > { %p27_p0 = scmp.ge.s32.totalorder %s25_s17, 4  ;;  %p63_p2 = scmp.eq.s32.totalorder %s1462_s16, 0 }
   0x5   : > { %s55_s20 = sadd.s32 1, %s1450_s13  ;;  %p1170_p5 = scmp.ge.s32.totalorder %s1462_s16, 4 }
   0x6   : > { %s1656_s17 = smov (%p27_p0, %s25_s17), 0  ;;  %p1522_p3 = por %p63_p2, %p62_p1 }
   0x7   : > { %s50_s19 = ssub.s32 %s1458_s15, %s1656_s17  ;;  %149 = sbr.rel (%p1170_p5) target bundleno = 24 (0x18), region = 20 }
   0x8   : > { %p53_p4 = scmp.eq.s32.totalorder %s50_s19, 0 }
   0xa   : > { %s1530_s21 = scalar_select %p53_p4, %s1450_s13, %s55_s20  }
   0xc   : > { %152 = sbr.rel (!%p1522_p3) target bundleno = 18 (0x12), region = 24  ;;  %s154_s22 = sand.u32 (%p1522_p3), 1, %s1450_s13  }
   0xd   : > { %s1254_s23 = sshll.u32 (%p1522_p3), %s1458_s15, 5  ;;  %s1171_s24 = sshll.u32 (%p1522_p3), %s154_s22, 4 }
   0xe   : > { %s160_s27 = scalar_lea.vmem (%p1522_p3), %s1647_s1, %s1254_s23  ;;  %s156_s28 = scalar_lea.vmem (%p1522_p3), [#allocation2], %s1171_s24 }
   0xf   : > { %v177_v0 = vld [vmem:[%s160_s27] sm:$0xf] (%p1522_p3)  ;;  %v179_v1 = vld [vmem:[%s160_s27 + $0x8] sm:$0xf] (%p1522_p3)  ;;  %v181_v2 = vld [vmem:[%s160_s27 + $0x10] sm:$0xf] (%p1522_p3) }
  0x10   : > { %178 = vst [vmem:[%s156_s28] sm:$0xf] (%p1522_p3), %v177_v0  ;;  %180 = vst [vmem:[%s156_s28 + $0x4] sm:$0xf] (%p1522_p3), %v179_v1  ;;  %v183_v3 = vld [vmem:[%s160_s27 + $0x18] sm:$0xf] (%p1522_p3) }
  0x11   : > { %182 = vst [vmem:[%s156_s28 + $0x8] sm:$0xf] %v181_v2  ;;  %184 = vst [vmem:[%s156_s28 + $0xc] sm:$0xf] %v183_v3 }
  0x12 PF: > { %216 = sbr.rel (!%p1522_p3) target bundleno = 24 (0x18), region = 65  ;;  %s218_s29 = sand.u32 (%p1522_p3), 1, %s1450_s13  }
  0x13   : > { %s1255_s30 = sshll.u32 (%p1522_p3), %s1458_s15, 5  ;;  %s1174_s4 = sshll.u32 (%p1522_p3), %s218_s29, 4 }
  0x14   : > { %s1099_s7 = scalar_lea.vmem (%p1522_p3), %s1648_s2, %s1255_s30  ;;  %s220_s8 = scalar_lea.vmem (%p1522_p3), [#allocation3], %s1174_s4 }
  0x15   : > { %v1177_v4 = vld [vmem:[%s1099_s7 + $0x4] sm:$0xf] (%p1522_p3)  ;;  %v1178_v5 = vld [vmem:[%s1099_s7 + $0xc] sm:$0xf] (%p1522_p3)  ;;  %v1179_v6 = vld [vmem:[%s1099_s7 + $0x14] sm:$0xf] (%p1522_p3) }
  0x16   : > { %243 = vst [vmem:[%s220_s8] sm:$0xf] (%p1522_p3), %v1177_v4  ;;  %245 = vst [vmem:[%s220_s8 + $0x4] sm:$0xf] (%p1522_p3), %v1178_v5  ;;  %v1180_v7 = vld [vmem:[%s1099_s7 + $0x1c] sm:$0xf] (%p1522_p3) }
  0x17   : > { %247 = vst [vmem:[%s220_s8 + $0x8] sm:$0xf] %v1179_v6  ;;  %249 = vst [vmem:[%s220_s8 + $0xc] sm:$0xf] %v1180_v7 }
  0x18 PF: > { %p1181_p6 = scmp.ge.s32.totalorder %s1462_s16, 1  ;;  %p280_p7 = scmp.lt.s32.totalorder %s1462_s16, 5 }
  0x1a   : > { %p281_p8 = pnand %p1181_p6, %p280_p7 }
  0x1b   : > { %s287_s9 = sand.u32 (!%p281_p8), 1, %s1446_s12   ;;  %s1464_s18 = smov (!%p281_p8), 127  }
  0x1c   : > { %284 = sbr.rel (%p281_p8) target bundleno = 439 (0x1b7), region = 106  ;;  %s1182_s10 = sshll.u32 (!%p281_p8), %s287_s9, 4 }
  0x1d   : > { %s289_s11 = scalar_lea.vmem (!%p281_p8), [#allocation2], %s1182_s10  ;;  %s296_s19 = scalar_lea.vmem (!%p281_p8), [#allocation3], %s1182_s10 }
  0x1e   : > { %s1465_s26 = smov (!%p281_p8), 126   ;;  %s1466_s27 = smov (!%p281_p8), 125  }
  0x1f   : > { %s1467_s30 = smov (!%p281_p8), 124   ;;  %s1468_s4 = smov (!%p281_p8), 123  }
  0x20   : > { %s1469_s5 = smov (!%p281_p8), 122   ;;  %s1470_s6 = smov (!%p281_p8), 121  }
  0x21   : > { %v1400_v8 = vld [vmem:[%s289_s11 + $0x8] sm:$0xff]   ;;  %v1401_v9 = vld [vmem:[%s289_s11] sm:$0xff]   ;;  %vm396_vm0 = vcmask 261120   ;;  %vm391_vm1 = vcmask 1039360   ;;  %vm540_vm2 = vcmask 1031168   ;;  %vm627_vm3 = vcmask 1022976  }
  0x22   : > { %387 = vrot.lane.b32.xlu0 %v1400_v8, %s1464_s18  ;;  %v1402_v10 = vld [vmem:[%s296_s19 + $0x8] sm:$0xff]   ;;  %1297 = vmatprep.subr.bf16.mxu1 %v1400_v8  ;;  %v1403_v11 = vld [vmem:[%s296_s19] sm:$0xff]   ;;  %vm714_vm4 = vcmask 1014784   ;;  %vm801_vm5 = vcmask 1006592   ;;  %vm888_vm6 = vcmask 998400   ;;  %vm975_vm7 = vcmask 990208  }
  0x23   : > { %383 = vrot.lane.b32.xlu1 %v1401_v9, %s1464_s18  ;;  %1298 = vmatpush3.bf16.msra.mxu1 %v1400_v8  ;;  %v1404_v12 = vld [vmem:[%s1646_s0 + $0x10] sm:$0xff]   ;;  %v1405_v13 = vld [vmem:[%s1646_s0] sm:$0xff]   ;;  %v1407_v14 = vld [vmem:[%s1646_s0 + $0x8] sm:$0xff]   ;;  %p325_p9 = scmp.lt.s32.totalorder %s1454_s14, 3 }
  0x24   : > { %1299 = vmatprep.subr.bf16.mxu1 %v1401_v9  ;;  %1293 = vmatprep.mubr.msk.bf16.mxu0 %vm396_vm0, %v1404_v12  ;;  %v1410_v15 = vld [vmem:[%s1646_s0 + $0x30] sm:$0xff]   ;;  %v1406_v24 = vld [vmem:[%s1646_s0 + $0x18] sm:$0xff]   ;;  %v1408_v27 = vld [vmem:[%s1646_s0 + $0x20] sm:$0xff]  }
  0x25   : > { %1301 = vmatprep.mubr.msk.bf16.mxu1 %vm396_vm0, %v1405_v13  ;;  %v1409_v33 = vld [vmem:[%s1646_s0 + $0x28] sm:$0xff]   ;;  %v1412_v35 = vld [vmem:[%s1646_s0 + $0x40] sm:$0xff]   ;;  %v1411_v38 = vld [vmem:[%s1646_s0 + $0x38] sm:$0xff]   ;;  %s1658_s14 = smov (!%p325_p9, %s1454_s14), 3 }
  0x26   : > { %389 = vrot.lane.b32.xlu0 %v1402_v10, %s1464_s18  ;;  %v1414_v40 = vld [vmem:[%s1646_s0 + $0x50] sm:$0xff]   ;;  %v1413_v49 = vld [vmem:[%s1646_s0 + $0x48] sm:$0xff]   ;;  %v1416_v51 = vld [vmem:[%s1646_s0 + $0x60] sm:$0xff]   ;;  %s1256_s10 = sshll.u32 %s1658_s14, 4 }
  0x27   : > { %385 = vrot.lane.b32.xlu1 %v1403_v11, %s1464_s18  ;;  %1300 = vmatpush3.bf16.msra.mxu1 %v1401_v9  ;;  %v1415_v54 = vld [vmem:[%s1646_s0 + $0x58] sm:$0xff]   ;;  %v1418_v56 = vld [vmem:[%s1646_s0 + $0x70] sm:$0xff]   ;;  %v1417_v1 = vld [vmem:[%s1646_s0 + $0x68] sm:$0xff]   ;;  %s332_s19 = scalar_lea.vmem %s1649_s3, %s1256_s10 }
  0x28   : > { %v1419_v5 = vld [vmem:[%s1646_s0 + $0x78] sm:$0xff]  }
  0x2a   : > { %536 = vrot.lane.b32.xlu0 %v1400_v8, %s1465_s26  ;;  %1302 = vmatmul.mubr.msk.bf16.vlgmr.msra.gmra.mxu1 %vm396_vm0, %v1407_v14 }
  0x2b   : > { %538 = vrot.lane.b32.xlu1 %v1402_v10, %s1465_s26  ;;  %1317 = vmatprep.mubr.msk.bf16.mxu1 %vm396_vm0, %v1410_v15 }
  0x2e   : > { %623 = vrot.lane.b32.xlu0 %v1400_v8, %s1466_s27 }
  0x2f   : > { %625 = vrot.lane.b32.xlu1 %v1402_v10, %s1466_s27 }
  0x32   : > { %532 = vrot.lane.b32.xlu0 %v1401_v9, %s1465_s26 }
  0x33   : > { %534 = vrot.lane.b32.xlu1 %v1403_v11, %s1465_s26 }
  0x36   : > { %619 = vrot.lane.b32.xlu0 %v1401_v9, %s1466_s27 }
  0x37   : > { %621 = vrot.lane.b32.xlu1 %v1403_v11, %s1466_s27 }
  0x3a   : > { %710 = vrot.lane.b32.xlu0 %v1400_v8, %s1467_s30 }
  0x3b   : > { %712 = vrot.lane.b32.xlu1 %v1402_v10, %s1467_s30 }
  0x3e   : > { %797 = vrot.lane.b32.xlu0 %v1400_v8, %s1468_s4 }
  0x3f   : > { %799 = vrot.lane.b32.xlu1 %v1402_v10, %s1468_s4 }
  0x42   : > { %706 = vrot.lane.b32.xlu0 %v1401_v9, %s1467_s30 }
  0x43   : > { %708 = vrot.lane.b32.xlu1 %v1403_v11, %s1467_s30 }
  0x46   : > { %793 = vrot.lane.b32.xlu0 %v1401_v9, %s1468_s4 }
  0x47   : > { %795 = vrot.lane.b32.xlu1 %v1403_v11, %s1468_s4 }
  0x4a   : > { %884 = vrot.lane.b32.xlu0 %v1400_v8, %s1469_s5 }
  0x4b   : > { %886 = vrot.lane.b32.xlu1 %v1402_v10, %s1469_s5 }
  0x4e   : > { %971 = vrot.lane.b32.xlu0 %v1400_v8, %s1470_s6 }
  0x4f   : > { %973 = vrot.lane.b32.xlu1 %v1402_v10, %s1470_s6 }
  0x52   : > { %880 = vrot.lane.b32.xlu0 %v1401_v9, %s1469_s5 }
  0x53   : > { %882 = vrot.lane.b32.xlu1 %v1403_v11, %s1469_s5 }
  0x56   : > { %967 = vrot.lane.b32.xlu0 %v1401_v9, %s1470_s6 }
  0x57   : > { %969 = vrot.lane.b32.xlu1 %v1403_v11, %s1470_s6 }
  0x94   : > { %v388_v16 = vpop.permute.xlu0 %387 }
  0x95   : > { %v384_v17 = vpop.permute.xlu1 %383 }
  0x98   : > { %v390_v18 = vpop.permute.xlu0 %389 }
  0x99   : > { %v386_v19 = vpop.permute.xlu1 %385  ;;  %v393_v20 = vsel %vm391_vm1, %v388_v16, %v390_v18 }
  0x9a   : > { %1289 = vmatprep.subr.bf16.mxu0 %v393_v20  ;;  %v392_v21 = vsel %vm391_vm1, %v384_v17, %v386_v19 }
  0x9b   : > { %1290 = vmatpush3.bf16.msra.mxu0 %v393_v20 }
  0x9c   : > { %v537_v22 = vpop.permute.xlu0 %536  ;;  %1291 = vmatprep.subr.bf16.mxu0 %v392_v21 }
  0x9d   : > { %v539_v23 = vpop.permute.xlu1 %538 }
  0x9e   : > { %v542_v25 = vsel %vm540_vm2, %v537_v22, %v539_v23 }
  0x9f   : > { %1292 = vmatpush3.bf16.msra.mxu0 %v392_v21 }
  0xa0   : > { %v624_v26 = vpop.permute.xlu0 %623  ;;  %1305 = vmatprep.subr.bf16.mxu0 %v542_v25 }
  0xa1   : > { %v626_v28 = vpop.permute.xlu1 %625 }
  0xa2   : > { %v629_v29 = vsel %vm627_vm3, %v624_v26, %v626_v28  ;;  %1294 = vmatmul.mubr.msk.bf16.vlgmr.msra.gmra.mxu0 %vm396_vm0, %v1406_v24 }
  0xa3   : > { %1313 = vmatprep.subr.bf16.mxu1 %v629_v29  ;;  %1306 = vmatpush3.bf16.msra.mxu0 %v542_v25 }
  0xa4   : > { %1314 = vmatpush3.bf16.msra.mxu1 %v629_v29  ;;  %v533_v30 = vpop.permute.xlu0 %532  ;;  %1309 = vmatprep.mubr.msk.bf16.mxu0 %vm396_vm0, %v1408_v27 }
  0xa5   : > { %v535_v31 = vpop.permute.xlu1 %534 }
  0xa6   : > { %v541_v32 = vsel %vm540_vm2, %v533_v30, %v535_v31 }
  0xa7   : > { %1307 = vmatprep.subr.bf16.mxu0 %v541_v32 }
  0xa8   : > { %1308 = vmatpush3.bf16.msra.mxu0 %v541_v32  ;;  %v620_v34 = vpop.permute.xlu0 %619 }
  0xa9   : > { %v622_v36 = vpop.permute.xlu1 %621 }
  0xaa   : > { %v628_v37 = vsel %vm627_vm3, %v620_v34, %v622_v36 }
  0xab   : > { %1315 = vmatprep.subr.bf16.mxu1 %v628_v37  ;;  %1310 = vmatmul.mubr.msk.bf16.vlgmr.msra.gmra.mxu0 %vm396_vm0, %v1409_v33 }
  0xac   : > { %1316 = vmatpush3.bf16.msra.mxu1 %v628_v37  ;;  %v711_v39 = vpop.permute.xlu0 %710  ;;  %1325 = vmatprep.mubr.msk.bf16.mxu0 %vm396_vm0, %v1412_v35 }
  0xad   : > { %v713_v41 = vpop.permute.xlu1 %712 }
  0xae   : > { %v716_v42 = vsel %vm714_vm4, %v711_v39, %v713_v41 }
  0xaf   : > { %1321 = vmatprep.subr.bf16.mxu0 %v716_v42  ;;  %1318 = vmatmul.mubr.msk.bf16.vlgmr.msra.gmra.mxu1 %vm396_vm0, %v1411_v38 }
  0xb0   : > { %1322 = vmatpush3.bf16.msra.mxu0 %v716_v42  ;;  %v798_v43 = vpop.permute.xlu0 %797  ;;  %1333 = vmatprep.mubr.msk.bf16.mxu1 %vm396_vm0, %v1414_v40 }
  0xb1   : > { %v800_v44 = vpop.permute.xlu1 %799 }
  0xb2   : > { %v803_v45 = vsel %vm801_vm5, %v798_v43, %v800_v44 }
  0xb3   : > { %1329 = vmatprep.subr.bf16.mxu1 %v803_v45 }
  0xb4   : > { %1330 = vmatpush3.bf16.msra.mxu1 %v803_v45  ;;  %v707_v46 = vpop.permute.xlu0 %706 }
  0xb5   : > { %v709_v47 = vpop.permute.xlu1 %708 }
  0xb6   : > { %v715_v48 = vsel %vm714_vm4, %v707_v46, %v709_v47 }
  0xb7   : > { %1323 = vmatprep.subr.bf16.mxu0 %v715_v48 }
  0xb8   : > { %1324 = vmatpush3.bf16.msra.mxu0 %v715_v48  ;;  %v794_v50 = vpop.permute.xlu0 %793 }
  0xb9   : > { %v796_v52 = vpop.permute.xlu1 %795 }
  0xba   : > { %v802_v53 = vsel %vm801_vm5, %v794_v50, %v796_v52 }
  0xbb   : > { %1326 = vmatmul.mubr.msk.bf16.vlgmr.msra.gmra.mxu0 %vm396_vm0, %v1413_v49  ;;  %1331 = vmatprep.subr.bf16.mxu1 %v802_v53 }
  0xbc   : > { %1332 = vmatpush3.bf16.msra.mxu1 %v802_v53  ;;  %v885_v55 = vpop.permute.xlu0 %884  ;;  %1341 = vmatprep.mubr.msk.bf16.mxu0 %vm396_vm0, %v1416_v51 }
  0xbd   : > { %v887_v57 = vpop.permute.xlu1 %886 }
  0xbe   : > { %v890_v58 = vsel %vm888_vm6, %v885_v55, %v887_v57 }
  0xbf   : > { %1334 = vmatmul.mubr.msk.bf16.vlgmr.msra.gmra.mxu1 %vm396_vm0, %v1415_v54  ;;  %1337 = vmatprep.subr.bf16.mxu0 %v890_v58 }
  0xc0   : > { %1338 = vmatpush3.bf16.msra.mxu0 %v890_v58  ;;  %v972_v59 = vpop.permute.xlu0 %971  ;;  %1349 = vmatprep.mubr.msk.bf16.mxu1 %vm396_vm0, %v1418_v56 }
  0xc1   : > { %v974_v60 = vpop.permute.xlu1 %973 }
  0xc2   : > { %v977_v61 = vsel %vm975_vm7, %v972_v59, %v974_v60 }
  0xc3   : > { %1345 = vmatprep.subr.bf16.mxu1 %v977_v61 }
  0xc4   : > { %1346 = vmatpush3.bf16.msra.mxu1 %v977_v61  ;;  %v881_v62 = vpop.permute.xlu0 %880 }
  0xc5   : > { %v883_v63 = vpop.permute.xlu1 %882 }
  0xc6   : > { %v889_v0 = vsel %vm888_vm6, %v881_v62, %v883_v63 }
  0xc7   : > { %1339 = vmatprep.subr.bf16.mxu0 %v889_v0 }
  0xc8   : > { %1340 = vmatpush3.bf16.msra.mxu0 %v889_v0  ;;  %v968_v2 = vpop.permute.xlu0 %967 }
  0xc9   : > { %v970_v3 = vpop.permute.xlu1 %969 }
  0xca   : > { %v976_v4 = vsel %vm975_vm7, %v968_v2, %v970_v3 }
  0xcb   : > { %1342 = vmatmul.mubr.msk.bf16.vlgmr.msra.gmra.mxu0 %vm396_vm0, %v1417_v1  ;;  %1347 = vmatprep.subr.bf16.mxu1 %v976_v4 }
  0xcc   : > { %1348 = vmatpush3.bf16.msra.mxu1 %v976_v4 }
  0xcf   : > { %1350 = vmatmul.mubr.msk.bf16.vlgmr.msra.gmra.mxu1 %vm396_vm0, %v1419_v5 }
  0xea   : > { %v1303_v7 = vpop.f32.mrf.mxu1 }
  0xec   : > { %v502_v10 = vpop.f32.mrf.mxu1 }
  0xee   : > { %v1304_v12 = vpop.f32.mrf.mxu1 }
  0xf0   : > { %v505_v13 = vpop.f32.mrf.mxu1 }
 0x162   : > { %v1295_v6 = vpop.f32.mrf.mxu0 }
 0x163   : > { %v511_v22 = vadd.f32 %v1303_v7, %v1295_v6 }
 0x164   : > { %v437_v8 = vpop.f32.mrf.mxu0 }
 0x165   : > { %v503_v26 = vadd.f32 %v502_v10, %v437_v8 }
 0x166   : > { %v1296_v9 = vpop.f32.mrf.mxu0 }
 0x167   : > { %v514_v28 = vadd.f32 %v1304_v12, %v1296_v9 }
 0x168   : > { %v440_v11 = vpop.f32.mrf.mxu0 }
 0x169   : > { %v506_v31 = vadd.f32 %v505_v13, %v440_v11 }
 0x16b   : > { %v1311_v14 = vpop.f32.mrf.mxu0 }
 0x16c   : > { %v602_v27 = vadd.f32 %v1311_v14, %v511_v22 }
 0x16d   : > { %v585_v15 = vpop.f32.mrf.mxu0 }
 0x16e   : > { %v600_v32 = vadd.f32 %v585_v15, %v503_v26 }
 0x16f   : > { %v1319_v16 = vpop.f32.mrf.mxu1  ;;  %v1312_v17 = vpop.f32.mrf.mxu0 }
 0x170   : > { %v689_v33 = vadd.f32 %v1319_v16, %v602_v27  ;;  %v603_v34 = vadd.f32 %v1312_v17, %v514_v28 }
 0x171   : > { %v672_v18 = vpop.f32.mrf.mxu1  ;;  %v588_v19 = vpop.f32.mrf.mxu0 }
 0x172   : > { %v687_v37 = vadd.f32 %v672_v18, %v600_v32  ;;  %v601_v38 = vadd.f32 %v588_v19, %v506_v31 }
 0x173   : > { %v1320_v20 = vpop.f32.mrf.mxu1 }
 0x174   : > { %v690_v41 = vadd.f32 %v1320_v20, %v603_v34 }
 0x175   : > { %v675_v23 = vpop.f32.mrf.mxu1 }
 0x176   : > { %v688_v46 = vadd.f32 %v675_v23, %v601_v38 }
 0x17b   : > { %v1327_v21 = vpop.f32.mrf.mxu0 }
 0x17c   : > { %v776_v39 = vadd.f32 %v1327_v21, %v689_v33 }
 0x17d   : > { %v759_v24 = vpop.f32.mrf.mxu0 }
 0x17e   : > { %v774_v42 = vadd.f32 %v759_v24, %v687_v37 }
 0x17f   : > { %v1335_v25 = vpop.f32.mrf.mxu1  ;;  %v1328_v29 = vpop.f32.mrf.mxu0 }
 0x180   : > { %v863_v43 = vadd.f32 %v1335_v25, %v776_v39  ;;  %v777_v47 = vadd.f32 %v1328_v29, %v690_v41 }
 0x181   : > { %v846_v30 = vpop.f32.mrf.mxu1  ;;  %v762_v35 = vpop.f32.mrf.mxu0 }
 0x182   : > { %v861_v48 = vadd.f32 %v846_v30, %v774_v42  ;;  %v775_v52 = vadd.f32 %v762_v35, %v688_v46 }
 0x183   : > { %v1336_v36 = vpop.f32.mrf.mxu1 }
 0x184   : > { %v864_v53 = vadd.f32 %v1336_v36, %v777_v47 }
 0x185   : > { %v849_v44 = vpop.f32.mrf.mxu1 }
 0x186   : > { %v862_v58 = vadd.f32 %v849_v44, %v775_v52 }
 0x18b   : > { %v1343_v40 = vpop.f32.mrf.mxu0 }
 0x18c   : > { %v950_v49 = vadd.f32 %v1343_v40, %v863_v43 }
 0x18d   : > { %v933_v45 = vpop.f32.mrf.mxu0 }
 0x18e   : > { %v948_v54 = vadd.f32 %v933_v45, %v861_v48 }
 0x18f   : > { %v1344_v50 = vpop.f32.mrf.mxu0  ;;  %v1351_v51 = vpop.f32.mrf.mxu1 }
 0x190   : > { %v1037_v55 = vadd.f32 %v1351_v51, %v950_v49  ;;  %v951_v59 = vadd.f32 %v1344_v50, %v864_v53 }
 0x191   : > { %v936_v56 = vpop.f32.mrf.mxu0  ;;  %v1020_v57 = vpop.f32.mrf.mxu1 }
 0x192   : > { %v1035_v60 = vadd.f32 %v1020_v57, %v948_v54  ;;  %v1041_v62 = vmul.f32 %v1037_v55, %v1037_v55  ;;  %v949_v63 = vadd.f32 %v936_v56, %v862_v58 }
 0x193   : > { %v1352_v61 = vpop.f32.mrf.mxu1 }
 0x194   : > { %v1039_v0 = vmul.f32 %v1035_v60, %v1035_v60  ;;  %v1038_v1 = vadd.f32 %v1352_v61, %v951_v59 }
 0x195   : > { %v1023_v2 = vpop.f32.mrf.mxu1 }
 0x196   : > { %v1043_v3 = vadd.f32 %v1041_v62, %v1039_v0  ;;  %v1036_v4 = vadd.f32 %v1023_v2, %v949_v63  ;;  %v1042_v6 = vmul.f32 %v1038_v1, %v1038_v1 }
 0x198   : > { %v1045_v5 = vmul.f32 10000.0, %v1043_v3  ;;  %v1040_v7 = vmul.f32 %v1036_v4, %v1036_v4 }
 0x19a   : > { %v1047_v8 = vadd.f32 1.0, %v1045_v5  ;;  %v1044_v9 = vadd.f32 %v1042_v6, %v1040_v7 }
 0x19c   : > { %1420 = vlog2.f32 %v1047_v8  ;;  %v1046_v10 = vmul.f32 10000.0, %v1044_v9 }
 0x19e   : > { %v1048_v11 = vadd.f32 1.0, %v1046_v10 }
 0x1a0   : > { %1422 = vlog2.f32 %v1048_v11 }
 0x1a9   : > { %v1421_v12 = vpop.eup %1420 }
 0x1aa   : > { %v1050_v13 = vmul.f32 0.6931472, %v1421_v12 }
 0x1ac   : > { %v1053_v14 = vmul.f32 0.4342945, %v1050_v13 }
 0x1ad   : > { %v1423_v15 = vpop.eup %1422 }
 0x1ae   : > { %v1250_v16 = vadd.f32 -0.5, %v1053_v14  ;;  %v1052_v17 = vmul.f32 0.6931472, %v1423_v15 }
 0x1b0   : > { %v1057_v18 = vmul.f32 0.5, %v1250_v16  ;;  %v1054_v19 = vmul.f32 0.4342945, %v1052_v17 }
 0x1b2   : > { %1059 = vst [vmem:[%s332_s19] sm:$0xff] %v1057_v18  ;;  %v1251_v20 = vadd.f32 -0.5, %v1054_v19 }
 0x1b4   : > { %v1058_v21 = vmul.f32 0.5, %v1251_v20 }
 0x1b6   : > { %1060 = vst [vmem:[%s332_s19 + $0x8] sm:$0xff] %v1058_v21 }
 0x1b7 PF: > { %s13_s16 = sadd.s32 1, %s1462_s16   ;;  %s1651_s12 = smov %s1450_s13 }
 0x1b8   : > { %p10_p10 = scmp.ge.s32.totalorder %s13_s16, 6   ;;  %s1652_s13 = smov %s1530_s21 }
 0x1b9   : > { %s1653_s14 = smov %s1458_s15  ;;  %s1654_s15 = smov %s1656_s17 }
 0x1ba   :  { %12 = sbr.rel (!%p10_p10) target bundleno = 3 (0x3), region = 164 }

// kernel: _forward_impl.2
= control target key start
LH: loop header
LB: loop body
LE: loop exit
PB: predicated region body
PF: predicated region fallthrough
CT: control target
= control target key end

     0   :  { %s1181_s12 = smov 0   ;;  %s1183_s13 = smov 0   ;;  %s1304_s0 = inlined_call_operand.vmem [shape: bf16[4,32,64], index: 0, kind: input, shape index: {}]   ;;  %s1305_s1 = inlined_call_operand.vmem [shape: bf16[4,64,256], index: 1, kind: input, shape index: {}, may-alias: {1,2}]   ;;  %s1306_s2 = inlined_call_operand.vmem [shape: bf16[4,64,256], index: 2, kind: input, shape index: {}, may-alias: {1,2}]   ;;  %s1307_s3 = inlined_call_operand.vmem [shape: f32[4,16,128], index: 3, kind: output, shape index: {}]  }
   0x1   :  { %s1185_s14 = smov 0   ;;  %s1187_s15 = smov 0  }
   0x2   :  { %s1189_s16 = smov 0  }
   0x3 LB: > { %s25_s17 = sadd.s32 1, %s1152_s15  ;;  %p62_p1 = scmp.ne.s32.totalorder %s1144_s13, %s1140_s12  ;;  %s1156_s16 = sphi %s1189_s16, %s13_s16   ;;  %s1152_s15 = sphi %s1187_s15, %s1312_s15   ;;  %s1148_s14 = sphi %s1185_s14, %s1311_s14   ;;  %s1144_s13 = sphi %s1183_s13, %s1310_s13   ;;  %s1140_s12 = sphi %s1181_s12, %s1309_s12  }
   0x4   : > { %p27_p0 = scmp.ge.s32.totalorder %s25_s17, 4  ;;  %p63_p2 = scmp.eq.s32.totalorder %s1156_s16, 0 }
   0x5   : > { %s55_s20 = sadd.s32 1, %s1144_s13  ;;  %p920_p5 = scmp.ge.s32.totalorder %s1156_s16, 4 }
   0x6   : > { %s1314_s17 = smov (%p27_p0, %s25_s17), 0  ;;  %p1212_p3 = por %p63_p2, %p62_p1 }
   0x7   : > { %s50_s19 = ssub.s32 %s1152_s15, %s1314_s17  ;;  %149 = sbr.rel (%p920_p5) target bundleno = 30 (0x1e), region = 20 }
   0x8   : > { %p53_p4 = scmp.eq.s32.totalorder %s50_s19, 0 }
   0xa   : > { %s1220_s21 = scalar_select %p53_p4, %s1144_s13, %s55_s20  }
   0xc   : > { %152 = sbr.rel (!%p1212_p3) target bundleno = 21 (0x15), region = 24  ;;  %s154_s22 = sand.u32 (%p1212_p3), 1, %s1144_s13  }
   0xd   : > { %s980_s23 = sshll.u32 (%p1212_p3), %s1152_s15, 6  ;;  %s921_s24 = sshll.u32 (%p1212_p3), %s154_s22, 5 }
   0xe   : > { %s160_s27 = scalar_lea.vmem (%p1212_p3), %s1305_s1, %s980_s23  ;;  %s156_s28 = scalar_lea.vmem (%p1212_p3), [#allocation2], %s921_s24 }
   0xf   : > { %v177_v0 = vld [vmem:[%s160_s27] sm:$0xf] (%p1212_p3)  ;;  %v179_v1 = vld [vmem:[%s160_s27 + $0x8] sm:$0xf] (%p1212_p3)  ;;  %v181_v2 = vld [vmem:[%s160_s27 + $0x10] sm:$0xf] (%p1212_p3) }
  0x10   : > { %178 = vst [vmem:[%s156_s28] sm:$0xf] (%p1212_p3), %v177_v0  ;;  %180 = vst [vmem:[%s156_s28 + $0x4] sm:$0xf] (%p1212_p3), %v179_v1  ;;  %v183_v3 = vld [vmem:[%s160_s27 + $0x18] sm:$0xf] (%p1212_p3) }
  0x11   : > { %v185_v4 = vld [vmem:[%s160_s27 + $0x20] sm:$0xf]  ;;  %182 = vst [vmem:[%s156_s28 + $0x8] sm:$0xf] %v181_v2  ;;  %184 = vst [vmem:[%s156_s28 + $0xc] sm:$0xf] %v183_v3 }
  0x12   : > { %186 = vst [vmem:[%s156_s28 + $0x10] sm:$0xf] %v185_v4  ;;  %v187_v5 = vld [vmem:[%s160_s27 + $0x28] sm:$0xf]  ;;  %v189_v6 = vld [vmem:[%s160_s27 + $0x30] sm:$0xf] }
  0x13   : > { %v191_v7 = vld [vmem:[%s160_s27 + $0x38] sm:$0xf]  ;;  %188 = vst [vmem:[%s156_s28 + $0x14] sm:$0xf] %v187_v5  ;;  %190 = vst [vmem:[%s156_s28 + $0x18] sm:$0xf] %v189_v6 }
  0x14   : > { %192 = vst [vmem:[%s156_s28 + $0x1c] sm:$0xf] %v191_v7 }
  0x15 PF: > { %232 = sbr.rel (!%p1212_p3) target bundleno = 30 (0x1e), region = 65  ;;  %s234_s29 = sand.u32 (%p1212_p3), 1, %s1144_s13  }
  0x16   : > { %s981_s30 = sshll.u32 (%p1212_p3), %s1152_s15, 6  ;;  %s924_s4 = sshll.u32 (%p1212_p3), %s234_s29, 5 }
  0x17   : > { %s849_s7 = scalar_lea.vmem (%p1212_p3), %s1306_s2, %s981_s30  ;;  %s236_s8 = scalar_lea.vmem (%p1212_p3), [#allocation3], %s924_s4 }
  0x18   : > { %v927_v8 = vld [vmem:[%s849_s7 + $0x4] sm:$0xf] (%p1212_p3)  ;;  %v928_v9 = vld [vmem:[%s849_s7 + $0xc] sm:$0xf] (%p1212_p3)  ;;  %v929_v10 = vld [vmem:[%s849_s7 + $0x14] sm:$0xf] (%p1212_p3) }
  0x19   : > { %259 = vst [vmem:[%s236_s8] sm:$0xf] (%p1212_p3), %v927_v8  ;;  %261 = vst [vmem:[%s236_s8 + $0x4] sm:$0xf] (%p1212_p3), %v928_v9  ;;  %v930_v11 = vld [vmem:[%s849_s7 + $0x1c] sm:$0xf] (%p1212_p3) }
  0x1a   : > { %v931_v12 = vld [vmem:[%s849_s7 + $0x24] sm:$0xf]  ;;  %263 = vst [vmem:[%s236_s8 + $0x8] sm:$0xf] %v929_v10  ;;  %265 = vst [vmem:[%s236_s8 + $0xc] sm:$0xf] %v930_v11 }
  0x1b   : > { %267 = vst [vmem:[%s236_s8 + $0x10] sm:$0xf] %v931_v12  ;;  %v932_v13 = vld [vmem:[%s849_s7 + $0x2c] sm:$0xf]  ;;  %v933_v14 = vld [vmem:[%s849_s7 + $0x34] sm:$0xf] }
  0x1c   : > { %v934_v15 = vld [vmem:[%s849_s7 + $0x3c] sm:$0xf]  ;;  %269 = vst [vmem:[%s236_s8 + $0x14] sm:$0xf] %v932_v13  ;;  %271 = vst [vmem:[%s236_s8 + $0x18] sm:$0xf] %v933_v14 }
  0x1d   : > { %273 = vst [vmem:[%s236_s8 + $0x1c] sm:$0xf] %v934_v15 }
  0x1e PF: > { %p935_p6 = scmp.ge.s32.totalorder %s1156_s16, 1  ;;  %p312_p7 = scmp.lt.s32.totalorder %s1156_s16, 5 }
  0x20   : > { %p313_p8 = pnand %p935_p6, %p312_p7 }
  0x21   : > { %s319_s9 = sand.u32 (!%p313_p8), 1, %s1140_s12   ;;  %s1158_s18 = smov (!%p313_p8), 127  }
  0x22   : > { %316 = sbr.rel (%p313_p8) target bundleno = 437 (0x1b5), region = 106  ;;  %s936_s10 = sshll.u32 (!%p313_p8), %s319_s9, 5 }
  0x23   : > { %s321_s11 = scalar_lea.vmem (!%p313_p8), [#allocation2], %s936_s10  ;;  %s328_s19 = scalar_lea.vmem (!%p313_p8), [#allocation3], %s936_s10 }
  0x24   : > { %s1159_s26 = smov (!%p313_p8), 126   ;;  %s1160_s27 = smov (!%p313_p8), 125  }
  0x25   : > { %p357_p9 = scmp.lt.s32.totalorder (!%p313_p8), %s1148_s14, 3 }
  0x27   : > { %v1098_v16 = vld [vmem:[%s321_s11 + $0x18] sm:$0xff]   ;;  %v1099_v17 = vld [vmem:[%s321_s11 + $0x10] sm:$0xff]   ;;  %v1103_v20 = vld [vmem:[%s321_s11 + $0x8] sm:$0xff]   ;;  %vm470_vm0 = vcmask 523264   ;;  %vm461_vm1 = vcmask 1039360   ;;  %vm622_vm2 = vcmask 1031168  }
  0x28   : > { %457 = vrot.lane.b32.xlu0 %v1098_v16, %s1158_s18  ;;  %v1100_v18 = vld [vmem:[%s328_s19 + $0x18] sm:$0xff]   ;;  %1019 = vmatprep.subr.bf16.mxu1 %v1098_v16  ;;  %v1101_v19 = vld [vmem:[%s328_s19 + $0x10] sm:$0xff]   ;;  %v1102_v21 = vld [vmem:[%s328_s19 + $0x8] sm:$0xff]   ;;  %vm721_vm3 = vcmask 1022976   ;;  %s1316_s14 = smov (!%p357_p9, %s1148_s14), 3 }
  0x29   : > { %453 = vrot.lane.b32.xlu1 %v1099_v17, %s1158_s18  ;;  %1020 = vmatpush3.bf16.msra.mxu1 %v1098_v16  ;;  %v1106_v22 = vld [vmem:[%s1304_s0 + $0x10] sm:$0xff]   ;;  %v1107_v23 = vld [vmem:[%s1304_s0] sm:$0xff]   ;;  %v1109_v26 = vld [vmem:[%s1304_s0 + $0x8] sm:$0xff]  }
  0x2a   : > { %1021 = vmatprep.subr.bf16.mxu1 %v1099_v17  ;;  %v1104_v24 = vld [vmem:[%s328_s19] sm:$0xff]   ;;  %1015 = vmatprep.mubr.msk.bf16.mxu0 %vm470_vm0, %v1106_v22  ;;  %v1112_v27 = vld [vmem:[%s1304_s0 + $0x30] sm:$0xff]   ;;  %v1108_v42 = vld [vmem:[%s1304_s0 + $0x18] sm:$0xff]  }
  0x2b   : > { %v1105_v25 = vld [vmem:[%s321_s11] sm:$0xff]   ;;  %1027 = vmatprep.mubr.msk.bf16.mxu1 %vm470_vm0, %v1107_v23  ;;  %v1111_v63 = vld [vmem:[%s1304_s0 + $0x28] sm:$0xff]   ;;  %v1113_v3 = vld [vmem:[%s1304_s0 + $0x38] sm:$0xff]   ;;  %s982_s11 = sshll.u32 %s1316_s14, 4 }
  0x2c   : > { %459 = vrot.lane.b32.xlu0 %v1100_v18, %s1158_s18  ;;  %v1110_v45 = vld [vmem:[%s1304_s0 + $0x20] sm:$0xff]   ;;  %s364_s12 = scalar_lea.vmem %s1307_s3, %s982_s11 }
  0x2d   : > { %455 = vrot.lane.b32.xlu1 %v1101_v19, %s1158_s18  ;;  %1022 = vmatpush3.bf16.msra.mxu1 %v1099_v17 }
  0x2e   : > { %1023 = vmatprep.subr.bf16.mxu1 %v1103_v20 }
  0x30   : > { %449 = vrot.lane.b32.xlu0 %v1103_v20, %s1158_s18 }
  0x31   : > { %451 = vrot.lane.b32.xlu1 %v1102_v21, %s1158_s18  ;;  %1024 = vmatpush3.bf16.msra.mxu1 %v1103_v20 }
  0x32   : > { %1025 = vmatprep.subr.bf16.mxu1 %v1105_v25 }
  0x34   : > { %445 = vrot.lane.b32.xlu0 %v1105_v25, %s1158_s18 }
  0x35   : > { %447 = vrot.lane.b32.xlu1 %v1104_v24, %s1158_s18  ;;  %1026 = vmatpush3.bf16.msra.mxu1 %v1105_v25 }
  0x38   : > { %618 = vrot.lane.b32.xlu0 %v1098_v16, %s1159_s26  ;;  %1028 = vmatmul.mubr.msk.bf16.vlgmr.msra.gmra.mxu1 %vm470_vm0, %v1109_v26 }
  0x39   : > { %620 = vrot.lane.b32.xlu1 %v1100_v18, %s1159_s26  ;;  %1051 = vmatprep.mubr.msk.bf16.mxu1 %vm470_vm0, %v1112_v27 }
  0x3c   : > { %717 = vrot.lane.b32.xlu0 %v1098_v16, %s1160_s27 }
  0x3d   : > { %719 = vrot.lane.b32.xlu1 %v1100_v18, %s1160_s27 }
  0x40   : > { %614 = vrot.lane.b32.xlu0 %v1099_v17, %s1159_s26 }
  0x41   : > { %616 = vrot.lane.b32.xlu1 %v1101_v19, %s1159_s26 }
  0x44   : > { %713 = vrot.lane.b32.xlu0 %v1099_v17, %s1160_s27 }
  0x45   : > { %715 = vrot.lane.b32.xlu1 %v1101_v19, %s1160_s27 }
  0x48   : > { %610 = vrot.lane.b32.xlu0 %v1103_v20, %s1159_s26 }
  0x49   : > { %612 = vrot.lane.b32.xlu1 %v1102_v21, %s1159_s26 }
  0x4c   : > { %709 = vrot.lane.b32.xlu0 %v1103_v20, %s1160_s27 }
  0x4d   : > { %711 = vrot.lane.b32.xlu1 %v1102_v21, %s1160_s27 }
  0x50   : > { %606 = vrot.lane.b32.xlu0 %v1105_v25, %s1159_s26 }
  0x51   : > { %608 = vrot.lane.b32.xlu1 %v1104_v24, %s1159_s26 }
  0x54   : > { %705 = vrot.lane.b32.xlu0 %v1105_v25, %s1160_s27 }
  0x55   : > { %707 = vrot.lane.b32.xlu1 %v1104_v24, %s1160_s27 }
  0x9a   : > { %v458_v28 = vpop.permute.xlu0 %457 }
  0x9b   : > { %v454_v29 = vpop.permute.xlu1 %453 }
  0x9e   : > { %v460_v30 = vpop.permute.xlu0 %459 }
  0x9f   : > { %v456_v31 = vpop.permute.xlu1 %455  ;;  %v465_v32 = vsel %vm461_vm1, %v458_v28, %v460_v30 }
  0xa0   : > { %1007 = vmatprep.subr.bf16.mxu0 %v465_v32  ;;  %v464_v33 = vsel %vm461_vm1, %v454_v29, %v456_v31 }
  0xa1   : > { %1008 = vmatpush3.bf16.msra.mxu0 %v465_v32 }
  0xa2   : > { %1009 = vmatprep.subr.bf16.mxu0 %v464_v33  ;;  %v450_v34 = vpop.permute.xlu0 %449 }
  0xa3   : > { %v452_v35 = vpop.permute.xlu1 %451 }
  0xa4   : > { %v463_v36 = vsel %vm461_vm1, %v450_v34, %v452_v35 }
  0xa5   : > { %1010 = vmatpush3.bf16.msra.mxu0 %v464_v33 }
  0xa6   : > { %1011 = vmatprep.subr.bf16.mxu0 %v463_v36  ;;  %v446_v37 = vpop.permute.xlu0 %445 }
  0xa7   : > { %v448_v38 = vpop.permute.xlu1 %447 }
  0xa8   : > { %v462_v39 = vsel %vm461_vm1, %v446_v37, %v448_v38 }
  0xa9   : > { %1012 = vmatpush3.bf16.msra.mxu0 %v463_v36 }
  0xaa   : > { %1013 = vmatprep.subr.bf16.mxu0 %v462_v39  ;;  %v619_v40 = vpop.permute.xlu0 %618 }
  0xab   : > { %v621_v41 = vpop.permute.xlu1 %620 }
  0xac   : > { %v626_v43 = vsel %vm622_vm2, %v619_v40, %v621_v41 }
  0xad   : > { %1014 = vmatpush3.bf16.msra.mxu0 %v462_v39 }
  0xae   : > { %1031 = vmatprep.subr.bf16.mxu0 %v626_v43  ;;  %v718_v44 = vpop.permute.xlu0 %717 }
  0xaf   : > { %v720_v46 = vpop.permute.xlu1 %719 }
  0xb0   : > { %v725_v47 = vsel %vm721_vm3, %v718_v44, %v720_v46  ;;  %1016 = vmatmul.mubr.msk.bf16.vlgmr.msra.gmra.mxu0 %vm470_vm0, %v1108_v42 }
  0xb1   : > { %1043 = vmatprep.subr.bf16.mxu1 %v725_v47  ;;  %1032 = vmatpush3.bf16.msra.mxu0 %v626_v43 }
  0xb2   : > { %1044 = vmatpush3.bf16.msra.mxu1 %v725_v47  ;;  %v615_v48 = vpop.permute.xlu0 %614  ;;  %1039 = vmatprep.mubr.msk.bf16.mxu0 %vm470_vm0, %v1110_v45 }
  0xb3   : > { %v617_v49 = vpop.permute.xlu1 %616 }
  0xb4   : > { %v625_v50 = vsel %vm622_vm2, %v615_v48, %v617_v49 }
  0xb5   : > { %1033 = vmatprep.subr.bf16.mxu0 %v625_v50 }
  0xb6   : > { %1034 = vmatpush3.bf16.msra.mxu0 %v625_v50  ;;  %v714_v51 = vpop.permute.xlu0 %713 }
  0xb7   : > { %v716_v52 = vpop.permute.xlu1 %715 }
  0xb8   : > { %v724_v53 = vsel %vm721_vm3, %v714_v51, %v716_v52 }
  0xb9   : > { %1045 = vmatprep.subr.bf16.mxu1 %v724_v53 }
  0xba   : > { %1046 = vmatpush3.bf16.msra.mxu1 %v724_v53  ;;  %v611_v54 = vpop.permute.xlu0 %610 }
  0xbb   : > { %v613_v55 = vpop.permute.xlu1 %612 }
  0xbc   : > { %v624_v56 = vsel %vm622_vm2, %v611_v54, %v613_v55 }
  0xbd   : > { %1035 = vmatprep.subr.bf16.mxu0 %v624_v56 }
  0xbe   : > { %1036 = vmatpush3.bf16.msra.mxu0 %v624_v56  ;;  %v710_v57 = vpop.permute.xlu0 %709 }
  0xbf   : > { %v712_v58 = vpop.permute.xlu1 %711 }
  0xc0   : > { %v723_v59 = vsel %vm721_vm3, %v710_v57, %v712_v58 }
  0xc1   : > { %1047 = vmatprep.subr.bf16.mxu1 %v723_v59 }
  0xc2   : > { %1048 = vmatpush3.bf16.msra.mxu1 %v723_v59  ;;  %v607_v60 = vpop.permute.xlu0 %606 }
  0xc3   : > { %v609_v61 = vpop.permute.xlu1 %608 }
  0xc4   : > { %v623_v62 = vsel %vm622_vm2, %v607_v60, %v609_v61 }
  0xc5   : > { %1037 = vmatprep.subr.bf16.mxu0 %v623_v62 }
  0xc6   : > { %1038 = vmatpush3.bf16.msra.mxu0 %v623_v62  ;;  %v706_v0 = vpop.permute.xlu0 %705 }
  0xc7   : > { %v708_v1 = vpop.permute.xlu1 %707 }
  0xc8   : > { %v722_v2 = vsel %vm721_vm3, %v706_v0, %v708_v1 }
  0xc9   : > { %1040 = vmatmul.mubr.msk.bf16.vlgmr.msra.gmra.mxu0 %vm470_vm0, %v1111_v63  ;;  %1049 = vmatprep.subr.bf16.mxu1 %v722_v2 }
  0xca   : > { %1050 = vmatpush3.bf16.msra.mxu1 %v722_v2 }
  0xcd   : > { %1052 = vmatmul.mubr.msk.bf16.vlgmr.msra.gmra.mxu1 %vm470_vm0, %v1113_v3 }
  0xf8   : > { %v1029_v5 = vpop.f32.mrf.mxu1 }
  0xfa   : > { %v576_v7 = vpop.f32.mrf.mxu1 }
  0xfc   : > { %v1030_v9 = vpop.f32.mrf.mxu1 }
  0xfe   : > { %v579_v13 = vpop.f32.mrf.mxu1 }
 0x170   : > { %v1017_v4 = vpop.f32.mrf.mxu0 }
 0x171   : > { %v585_v12 = vadd.f32 %v1029_v5, %v1017_v4 }
 0x172   : > { %v511_v6 = vpop.f32.mrf.mxu0 }
 0x173   : > { %v577_v15 = vadd.f32 %v576_v7, %v511_v6 }
 0x174   : > { %v1018_v8 = vpop.f32.mrf.mxu0 }
 0x175   : > { %v588_v19 = vadd.f32 %v1030_v9, %v1018_v8 }
 0x176   : > { %v514_v10 = vpop.f32.mrf.mxu0 }
 0x177   : > { %v580_v24 = vadd.f32 %v579_v13, %v514_v10 }
 0x189   : > { %v1041_v11 = vpop.f32.mrf.mxu0 }
 0x18a   : > { %v688_v16 = vadd.f32 %v1041_v11, %v585_v12 }
 0x18b   : > { %v671_v14 = vpop.f32.mrf.mxu0 }
 0x18c   : > { %v686_v20 = vadd.f32 %v671_v14, %v577_v15 }
 0x18d   : > { %v1042_v17 = vpop.f32.mrf.mxu0  ;;  %v1053_v18 = vpop.f32.mrf.mxu1 }
 0x18e   : > { %v787_v21 = vadd.f32 %v1053_v18, %v688_v16  ;;  %v689_v25 = vadd.f32 %v1042_v17, %v588_v19 }
 0x18f   : > { %v674_v22 = vpop.f32.mrf.mxu0  ;;  %v770_v23 = vpop.f32.mrf.mxu1 }
 0x190   : > { %v785_v26 = vadd.f32 %v770_v23, %v686_v20  ;;  %v791_v28 = vmul.f32 %v787_v21, %v787_v21  ;;  %v687_v29 = vadd.f32 %v674_v22, %v580_v24 }
 0x191   : > { %v1054_v27 = vpop.f32.mrf.mxu1 }
 0x192   : > { %v789_v30 = vmul.f32 %v785_v26, %v785_v26  ;;  %v788_v31 = vadd.f32 %v1054_v27, %v689_v25 }
 0x193   : > { %v773_v32 = vpop.f32.mrf.mxu1 }
 0x194   : > { %v793_v33 = vadd.f32 %v791_v28, %v789_v30  ;;  %v786_v34 = vadd.f32 %v773_v32, %v687_v29  ;;  %v792_v36 = vmul.f32 %v788_v31, %v788_v31 }
 0x196   : > { %v795_v35 = vmul.f32 10000.0, %v793_v33  ;;  %v790_v37 = vmul.f32 %v786_v34, %v786_v34 }
 0x198   : > { %v797_v38 = vadd.f32 1.0, %v795_v35  ;;  %v794_v39 = vadd.f32 %v792_v36, %v790_v37 }
 0x19a   : > { %1114 = vlog2.f32 %v797_v38  ;;  %v796_v40 = vmul.f32 10000.0, %v794_v39 }
 0x19c   : > { %v798_v41 = vadd.f32 1.0, %v796_v40 }
 0x19e   : > { %1116 = vlog2.f32 %v798_v41 }
 0x1a7   : > { %v1115_v42 = vpop.eup %1114 }
 0x1a8   : > { %v800_v43 = vmul.f32 0.6931472, %v1115_v42 }
 0x1aa   : > { %v803_v44 = vmul.f32 0.4342945, %v800_v43 }
 0x1ab   : > { %v1117_v45 = vpop.eup %1116 }
 0x1ac   : > { %v976_v46 = vadd.f32 -0.5, %v803_v44  ;;  %v802_v47 = vmul.f32 0.6931472, %v1117_v45 }
 0x1ae   : > { %v807_v48 = vmul.f32 0.5, %v976_v46  ;;  %v804_v49 = vmul.f32 0.4342945, %v802_v47 }
 0x1b0   : > { %809 = vst [vmem:[%s364_s12] sm:$0xff] %v807_v48  ;;  %v977_v50 = vadd.f32 -0.5, %v804_v49 }
 0x1b2   : > { %v808_v51 = vmul.f32 0.5, %v977_v50 }
 0x1b4   : > { %810 = vst [vmem:[%s364_s12 + $0x8] sm:$0xff] %v808_v51 }
 0x1b5 PF: > { %s13_s16 = sadd.s32 1, %s1156_s16   ;;  %s1309_s12 = smov %s1144_s13 }
 0x1b6   : > { %p10_p10 = scmp.ge.s32.totalorder %s13_s16, 6   ;;  %s1310_s13 = smov %s1220_s21 }
 0x1b7   : > { %s1311_s14 = smov %s1152_s15  ;;  %s1312_s15 = smov %s1314_s17 }
 0x1b8   :  { %12 = sbr.rel (!%p10_p10) target bundleno = 3 (0x3), region = 160 }

</bundles_post_ra>
